<compile_context>
chip_gen: v5e
topology: v5e:2x2
jax: 0.10.0
libtpu: 0.0.40
codegen_flags: <defaults>
</compile_context>

<pallas_src>
import math

import jax
import jax.numpy as jnp
from jax.experimental import pallas as pl
from jax.experimental.pallas import tpu as pltpu


# ----------------------------- Pallas kernel --------------------------------

def _make_pinn_kernel(num_layers: int):
    """Fused MLP kernel: `num_layers` (Linear + Swish) blocks + final Linear.

    Ref order:
        c_ref      (4, N_tile)            stacked x,y,z,t rows
        betas_ref  (1, num_layers)        Swish betas
        w0_ref     (H, 4)                 first-layer weight (PyTorch (out,in))
        ball_ref   (H, num_layers)        column i = bias of hidden layer i
        [whid_ref  (num_layers-1, H, H)]  stacked hidden weights (if any)
        wout_ref   (out_dim, H)
        bout_ref   (out_dim, 1)
        out_ref    (out_dim, N_tile)
    """
    num_hidden = num_layers - 1
    hp = jax.lax.Precision.HIGHEST

    def swish(v, beta):
        # v * sigmoid(beta*v), sigmoid via the exact tanh identity:
        # sigmoid(z) = 0.5*(1 + tanh(0.5*z)) -> one EUP op per element.
        return v * (0.5 * jnp.tanh((0.5 * beta) * v) + 0.5)

    def kernel(c_ref, betas_ref, w0_ref, ball_ref, *rest):
        if num_hidden > 0:
            whid_ref, wout_ref, bout_ref, out_ref = rest
        else:
            wout_ref, bout_ref, out_ref = rest

        c = c_ref[...]                       # (4, N_tile)
        w0 = w0_ref[...]                     # (H, 4)
        betas = betas_ref[...]               # (1, num_layers)

        # ---- layer 0 (in_features = 4): lane-broadcast FMAs on the VPU ----
        h = (w0[:, 0:1] * c[0:1, :]
             + w0[:, 1:2] * c[1:2, :]
             + w0[:, 2:3] * c[2:3, :]
             + w0[:, 3:4] * c[3:4, :]
             + ball_ref[:, 0:1])             # (H, N_tile)
        h = swish(h, betas[0:1, 0:1])

        # ---- hidden layers: (H, H) @ (H, N_tile) on the MXU, f32 acc ----
        for i in range(num_hidden):
            h = (jnp.dot(whid_ref[i], h,
                         preferred_element_type=jnp.float32, precision=hp)
                 + ball_ref[:, i + 1:i + 2])
            h = swish(h, betas[0:1, i + 1:i + 2])

        # ---- output layer ----
        out_ref[...] = (jnp.dot(wout_ref[...], h,
                                preferred_element_type=jnp.float32, precision=hp)
                        + bout_ref[...])

    return kernel


# ------------------------------- Wrapper -------------------------------------

def base_pinn_forward(x, y, z, t, params, *, block_n: int = 2048):
    """JAX wrapper reproducing BasePINN.forward (use_batch_norm=False path).

    x, y, z, t : (N, 1) float32 arrays (collocation points).
    params     : dict with 'weights' (list of (out, in) matrices, PyTorch layout),
                 'biases' (list of (out,) vectors), 'betas' ((num_layers,)).
    Returns (N, out_dim) float32.

    block_n: batch tile on the lane axis (multiple of 128). 2048 is a good
    default for v6e/v7x; cap around 1024 on v5e.
    """
    weights = [jnp.asarray(w, jnp.float32) for w in params["weights"]]
    biases = [jnp.asarray(b, jnp.float32) for b in params["biases"]]
    betas = jnp.asarray(params["betas"], jnp.float32)

    num_layers = len(weights) - 1
    num_hidden = num_layers - 1
    hidden = weights[0].shape[0]
    out_dim = weights[-1].shape[0]
    n = x.shape[0]

    # Batch-on-lanes: one stacked (4, N) coordinate slab -> one DMA stream.
    coords = jnp.concatenate(
        [jnp.reshape(a, (1, n)).astype(jnp.float32) for a in (x, y, z, t)], axis=0)

    # Pad the batch so every tile is full (block_n is a multiple of 128).
    bn = block_n
    n_pad = ((n + bn - 1) // bn) * bn
    if n_pad != n:
        coords = jnp.pad(coords, ((0, 0), (0, n_pad - n)))
    num_tiles = n_pad // bn

    # Stack per-layer parameters so the kernel sees few, constant-index inputs.
    w0 = weights[0]                                            # (H, 4)
    w_out = weights[num_layers]                                # (out_dim, H)
    b_all = jnp.stack([biases[i].reshape(hidden)
                       for i in range(num_layers)], axis=1)    # (H, num_layers)
    b_out = biases[num_layers].reshape(out_dim, 1)             # (out_dim, 1)
    betas2d = betas.reshape(1, num_layers)                     # (1, num_layers)

    const2 = lambda i: (0, 0)
    coord_spec = pl.BlockSpec((4, bn), lambda i: (0, i))
    out_spec = pl.BlockSpec((out_dim, bn), lambda i: (0, i))

    args = [coords, betas2d, w0, b_all]
    in_specs = [coord_spec,
                pl.BlockSpec(betas2d.shape, const2),
                pl.BlockSpec(w0.shape, const2),
                pl.BlockSpec(b_all.shape, const2)]
    if num_hidden > 0:
        w_hid = jnp.stack(weights[1:num_layers], axis=0)       # (L-1, H, H)
        args.append(w_hid)
        in_specs.append(pl.BlockSpec(w_hid.shape, lambda i: (0, 0, 0)))
    args += [w_out, b_out]
    in_specs += [pl.BlockSpec(w_out.shape, const2),
                 pl.BlockSpec(b_out.shape, const2)]

    grid_spec = pltpu.PrefetchScalarGridSpec(
        num_scalar_prefetch=0,
        grid=(num_tiles,),
        in_specs=in_specs,
        out_specs=out_spec,
    )

    out_rows = pl.pallas_call(
        _make_pinn_kernel(num_layers),
        out_shape=jax.ShapeDtypeStruct((out_dim, n_pad), jnp.float32),
        grid_spec=grid_spec,
        compiler_params=pltpu.CompilerParams(
            dimension_semantics=("parallel",),   # shard batch axis across TCs
        ),
    )(*args)                                     # (out_dim, n_pad)

    # Back to the PyTorch-facing (N, out_dim) shape.
    return out_rows[:, :n].T


# --------------------------- Parameter construction --------------------------

def init_params(key, num_layers=3, units_per_layer=32, out_dim=1, inp_dim=4):
    """Deterministic init matching BasePINN.__init__ + init_weights:
    Linear weights ~ kaiming_normal_ (fan_in, gain=sqrt(2)), biases zero,
    Swish beta = 1.0 per activation.  Weights in PyTorch (out, in) layout."""
    weights, biases = [], []
    in_f = inp_dim
    for i in range(num_layers + 1):
        out_f = units_per_layer if i < num_layers else out_dim
        key, sub = jax.random.split(key)
        std = math.sqrt(2.0 / in_f)                        # kaiming_normal_, fan_in
        weights.append(jax.random.normal(sub, (out_f, in_f), jnp.float32) * std)
        biases.append(jnp.zeros((out_f,), jnp.float32))
        in_f = out_f
    betas = jnp.ones((num_layers,), jnp.float32)
    return {"weights": weights, "biases": biases, "betas": betas}


def reference_forward(x, y, z, t, params):
    """Pure-JAX reference (PyTorch math: h @ W.T + b, exact sigmoid)."""
    h = jnp.concatenate([x, y, z, t], axis=1)              # (N, 4)
    ws, bs, betas = params["weights"], params["biases"], params["betas"]
    hp = jax.lax.Precision.HIGHEST
    for i in range(len(ws) - 1):
        h = jnp.dot(h, ws[i].T, precision=hp) + bs[i]
        h = h * jax.nn.sigmoid(betas[i] * h)
    return jnp.dot(h, ws[-1].T, precision=hp) + bs[-1]


# ----------------------------------- Main ------------------------------------

if __name__ == "__main__":
    key = jax.random.PRNGKey(0)
    k_param, kx, ky, kz, kt = jax.random.split(key, 5)

    N = 4096                     # collocation points -> 8 grid tiles of 512
    params = init_params(k_param, num_layers=3, units_per_layer=32, out_dim=1)

    x = jax.random.normal(kx, (N, 1), jnp.float32)
    y = jax.random.normal(ky, (N, 1), jnp.float32)
    z = jax.random.normal(kz, (N, 1), jnp.float32)
    t = jax.random.normal(kt, (N, 1), jnp.float32)

    out = base_pinn_forward(x, y, z, t, params, block_n=512)
    out = jax.block_until_ready(out)

    ref = reference_forward(x, y, z, t, params)
    assert out.shape == (N, 1)
    max_err = float(jnp.max(jnp.abs(out - ref)))
    assert jnp.allclose(out, ref, atol=2e-3, rtol=2e-3), (
        f"mismatch vs JAX reference (max abs err {max_err:.3e})")

    print("KERNEL_OK")
</pallas_src>

<mosaic_0001>
module attributes {stable_mosaic.version = 11 : i64} {
  func.func @kernel(%arg0: i32, %arg1: memref<4x512xf32, #tpu.memory_space<vmem>>, %arg2: memref<1x3xf32, #tpu.memory_space<vmem>>, %arg3: memref<32x4xf32, #tpu.memory_space<vmem>>, %arg4: memref<32x3xf32, #tpu.memory_space<vmem>>, %arg5: memref<2x32x32xf32, #tpu.memory_space<vmem>>, %arg6: memref<1x32xf32, #tpu.memory_space<vmem>>, %arg7: memref<1x1xf32, #tpu.memory_space<vmem>>, %arg8: memref<1x512xf32, #tpu.memory_space<vmem>>) attributes {dimension_semantics = [#tpu.dimension_semantics<parallel>], iteration_bounds = array<i64: 8>, scalar_prefetch = 0 : i64, scratch_operands = 0 : i64, tpu.core_type = #tpu.core_type<tc>, window_params = [{transform_indices = @transform_0, window_bounds = array<i64: 4, 512>}, {pipeline_mode = #tpu.pipeline_mode<synchronous>, transform_indices = @transform_1, window_bounds = array<i64: 1, 3>}, {pipeline_mode = #tpu.pipeline_mode<synchronous>, transform_indices = @transform_2, window_bounds = array<i64: 32, 4>}, {pipeline_mode = #tpu.pipeline_mode<synchronous>, transform_indices = @transform_3, window_bounds = array<i64: 32, 3>}, {pipeline_mode = #tpu.pipeline_mode<synchronous>, transform_indices = @transform_4, window_bounds = array<i64: 2, 32, 32>}, {pipeline_mode = #tpu.pipeline_mode<synchronous>, transform_indices = @transform_5, window_bounds = array<i64: 1, 32>}, {pipeline_mode = #tpu.pipeline_mode<synchronous>, transform_indices = @transform_6, window_bounds = array<i64: 1, 1>}, {transform_indices = @transform_7, window_bounds = array<i64: 1, 512>}]} {
    %c0 = arith.constant 0 : index
    %c0_0 = arith.constant 0 : index
    %0 = vector.load %arg1[%c0, %c0_0] : memref<4x512xf32, #tpu.memory_space<vmem>>, vector<4x512xf32>
    %c0_1 = arith.constant 0 : index
    %c0_2 = arith.constant 0 : index
    %1 = vector.load %arg3[%c0_1, %c0_2] : memref<32x4xf32, #tpu.memory_space<vmem>>, vector<32x4xf32>
    %c0_3 = arith.constant 0 : index
    %c0_4 = arith.constant 0 : index
    %2 = vector.load %arg2[%c0_3, %c0_4] : memref<1x3xf32, #tpu.memory_space<vmem>>, vector<1x3xf32>
    %3 = vector.extract_strided_slice %1 {offsets = [0, 0], sizes = [32, 1], strides = [1, 1]} : vector<32x4xf32> to vector<32x1xf32>
    %4 = vector.extract_strided_slice %0 {offsets = [0, 0], sizes = [1, 512], strides = [1, 1]} : vector<4x512xf32> to vector<1x512xf32>
    %5 = vector.broadcast %3 : vector<32x1xf32> to vector<32x512xf32>
    %6 = vector.broadcast %4 : vector<1x512xf32> to vector<32x512xf32>
    %7 = arith.mulf %5, %6 : vector<32x512xf32>
    %8 = vector.extract_strided_slice %1 {offsets = [0, 1], sizes = [32, 1], strides = [1, 1]} : vector<32x4xf32> to vector<32x1xf32>
    %9 = vector.extract_strided_slice %0 {offsets = [1, 0], sizes = [1, 512], strides = [1, 1]} : vector<4x512xf32> to vector<1x512xf32>
    %10 = vector.broadcast %8 : vector<32x1xf32> to vector<32x512xf32>
    %11 = vector.broadcast %9 : vector<1x512xf32> to vector<32x512xf32>
    %12 = arith.mulf %10, %11 : vector<32x512xf32>
    %13 = arith.addf %7, %12 : vector<32x512xf32>
    %14 = vector.extract_strided_slice %1 {offsets = [0, 2], sizes = [32, 1], strides = [1, 1]} : vector<32x4xf32> to vector<32x1xf32>
    %15 = vector.extract_strided_slice %0 {offsets = [2, 0], sizes = [1, 512], strides = [1, 1]} : vector<4x512xf32> to vector<1x512xf32>
    %16 = vector.broadcast %14 : vector<32x1xf32> to vector<32x512xf32>
    %17 = vector.broadcast %15 : vector<1x512xf32> to vector<32x512xf32>
    %18 = arith.mulf %16, %17 : vector<32x512xf32>
    %19 = arith.addf %13, %18 : vector<32x512xf32>
    %20 = vector.extract_strided_slice %1 {offsets = [0, 3], sizes = [32, 1], strides = [1, 1]} : vector<32x4xf32> to vector<32x1xf32>
    %21 = vector.extract_strided_slice %0 {offsets = [3, 0], sizes = [1, 512], strides = [1, 1]} : vector<4x512xf32> to vector<1x512xf32>
    %22 = vector.broadcast %20 : vector<32x1xf32> to vector<32x512xf32>
    %23 = vector.broadcast %21 : vector<1x512xf32> to vector<32x512xf32>
    %24 = arith.mulf %22, %23 : vector<32x512xf32>
    %25 = arith.addf %19, %24 : vector<32x512xf32>
    %c0_5 = arith.constant 0 : index
    %c0_6 = arith.constant 0 : index
    %26 = vector.load %arg4[%c0_5, %c0_6] : memref<32x3xf32, #tpu.memory_space<vmem>>, vector<32x1xf32>
    %27 = vector.broadcast %26 : vector<32x1xf32> to vector<32x512xf32>
    %28 = arith.addf %25, %27 : vector<32x512xf32>
    %29 = vector.extract_strided_slice %2 {offsets = [0, 0], sizes = [1, 1], strides = [1, 1]} : vector<1x3xf32> to vector<1x1xf32>
    %cst = arith.constant 5.000000e-01 : f32
    %30 = vector.broadcast %cst : f32 to vector<1x1xf32>
    %31 = arith.mulf %30, %29 : vector<1x1xf32>
    %32 = vector.broadcast %31 : vector<1x1xf32> to vector<32x512xf32>
    %33 = arith.mulf %32, %28 : vector<32x512xf32>
    %34 = math.tanh %33 : vector<32x512xf32>
    %cst_7 = arith.constant 5.000000e-01 : f32
    %35 = vector.broadcast %cst_7 : f32 to vector<32x512xf32>
    %36 = arith.mulf %35, %34 : vector<32x512xf32>
    %cst_8 = arith.constant 5.000000e-01 : f32
    %37 = vector.broadcast %cst_8 : f32 to vector<32x512xf32>
    %38 = arith.addf %36, %37 : vector<32x512xf32>
    %39 = arith.mulf %28, %38 : vector<32x512xf32>
    %c0_9 = arith.constant 0 : index
    %c0_10 = arith.constant 0 : index
    %c0_11 = arith.constant 0 : index
    %40 = vector.load %arg5[%c0_9, %c0_10, %c0_11] : memref<2x32x32xf32, #tpu.memory_space<vmem>>, vector<1x32x32xf32>
    %41 = vector.shape_cast %40 : vector<1x32x32xf32> to vector<32x32xf32>
    %cst_12 = arith.constant dense<0.000000e+00> : vector<32x512xf32>
    %42 = tpu.matmul %41, %39, %cst_12 {dimension_numbers = #tpu.dot_dimension_numbers<[1], [0], [0], [1], [0, 0, 1, 1], [], []>, precision = #tpu.contract_precision<fp32>} : vector<32x32xf32>, vector<32x512xf32>, vector<32x512xf32> -> vector<32x512xf32>
    %c0_13 = arith.constant 0 : index
    %c1 = arith.constant 1 : index
    %43 = vector.load %arg4[%c0_13, %c1] : memref<32x3xf32, #tpu.memory_space<vmem>>, vector<32x1xf32>
    %44 = vector.broadcast %43 : vector<32x1xf32> to vector<32x512xf32>
    %45 = arith.addf %42, %44 : vector<32x512xf32>
    %46 = vector.extract_strided_slice %2 {offsets = [0, 1], sizes = [1, 1], strides = [1, 1]} : vector<1x3xf32> to vector<1x1xf32>
    %cst_14 = arith.constant 5.000000e-01 : f32
    %47 = vector.broadcast %cst_14 : f32 to vector<1x1xf32>
    %48 = arith.mulf %47, %46 : vector<1x1xf32>
    %49 = vector.broadcast %48 : vector<1x1xf32> to vector<32x512xf32>
    %50 = arith.mulf %49, %45 : vector<32x512xf32>
    %51 = math.tanh %50 : vector<32x512xf32>
    %cst_15 = arith.constant 5.000000e-01 : f32
    %52 = vector.broadcast %cst_15 : f32 to vector<32x512xf32>
    %53 = arith.mulf %52, %51 : vector<32x512xf32>
    %cst_16 = arith.constant 5.000000e-01 : f32
    %54 = vector.broadcast %cst_16 : f32 to vector<32x512xf32>
    %55 = arith.addf %53, %54 : vector<32x512xf32>
    %56 = arith.mulf %45, %55 : vector<32x512xf32>
    %c1_17 = arith.constant 1 : index
    %c0_18 = arith.constant 0 : index
    %c0_19 = arith.constant 0 : index
    %57 = vector.load %arg5[%c1_17, %c0_18, %c0_19] : memref<2x32x32xf32, #tpu.memory_space<vmem>>, vector<1x32x32xf32>
    %58 = vector.shape_cast %57 : vector<1x32x32xf32> to vector<32x32xf32>
    %cst_20 = arith.constant dense<0.000000e+00> : vector<32x512xf32>
    %59 = tpu.matmul %58, %56, %cst_20 {dimension_numbers = #tpu.dot_dimension_numbers<[1], [0], [0], [1], [0, 0, 1, 1], [], []>, precision = #tpu.contract_precision<fp32>} : vector<32x32xf32>, vector<32x512xf32>, vector<32x512xf32> -> vector<32x512xf32>
    %c0_21 = arith.constant 0 : index
    %c2 = arith.constant 2 : index
    %60 = vector.load %arg4[%c0_21, %c2] : memref<32x3xf32, #tpu.memory_space<vmem>>, vector<32x1xf32>
    %61 = vector.broadcast %60 : vector<32x1xf32> to vector<32x512xf32>
    %62 = arith.addf %59, %61 : vector<32x512xf32>
    %63 = vector.extract_strided_slice %2 {offsets = [0, 2], sizes = [1, 1], strides = [1, 1]} : vector<1x3xf32> to vector<1x1xf32>
    %cst_22 = arith.constant 5.000000e-01 : f32
    %64 = vector.broadcast %cst_22 : f32 to vector<1x1xf32>
    %65 = arith.mulf %64, %63 : vector<1x1xf32>
    %66 = vector.broadcast %65 : vector<1x1xf32> to vector<32x512xf32>
    %67 = arith.mulf %66, %62 : vector<32x512xf32>
    %68 = math.tanh %67 : vector<32x512xf32>
    %cst_23 = arith.constant 5.000000e-01 : f32
    %69 = vector.broadcast %cst_23 : f32 to vector<32x512xf32>
    %70 = arith.mulf %69, %68 : vector<32x512xf32>
    %cst_24 = arith.constant 5.000000e-01 : f32
    %71 = vector.broadcast %cst_24 : f32 to vector<32x512xf32>
    %72 = arith.addf %70, %71 : vector<32x512xf32>
    %73 = arith.mulf %62, %72 : vector<32x512xf32>
    %c0_25 = arith.constant 0 : index
    %c0_26 = arith.constant 0 : index
    %74 = vector.load %arg6[%c0_25, %c0_26] : memref<1x32xf32, #tpu.memory_space<vmem>>, vector<1x32xf32>
    %cst_27 = arith.constant dense<0.000000e+00> : vector<1x512xf32>
    %75 = tpu.matmul %74, %73, %cst_27 {dimension_numbers = #tpu.dot_dimension_numbers<[1], [0], [0], [1], [0, 0, 1, 1], [], []>, precision = #tpu.contract_precision<fp32>} : vector<1x32xf32>, vector<32x512xf32>, vector<1x512xf32> -> vector<1x512xf32>
    %c0_28 = arith.constant 0 : index
    %c0_29 = arith.constant 0 : index
    %76 = vector.load %arg7[%c0_28, %c0_29] : memref<1x1xf32, #tpu.memory_space<vmem>>, vector<1x1xf32>
    %77 = vector.broadcast %76 : vector<1x1xf32> to vector<1x512xf32>
    %78 = arith.addf %75, %77 : vector<1x512xf32>
    %c0_30 = arith.constant 0 : index
    %c0_31 = arith.constant 0 : index
    %79 = vector.load %arg8[%c0_30, %c0_31] : memref<1x512xf32, #tpu.memory_space<vmem>>, vector<1x512xf32>
    tpu.vector_store %arg8[%c0_30, %c0_31], %78 {strides = array<i32>} : memref<1x512xf32, #tpu.memory_space<vmem>>, vector<1x512xf32>,
    return
  }
  func.func @transform_0(%arg0: i32) -> (i32, i32) {
    %c0_i32 = arith.constant 0 : i32
    %c0_i32_0 = arith.constant 0 : i32
    return %c0_i32, %arg0 : i32, i32
  }
  func.func @transform_1(%arg0: i32) -> (i32, i32) {
    %c0_i32 = arith.constant 0 : i32
    %c0_i32_0 = arith.constant 0 : i32
    %c0_i32_1 = arith.constant 0 : i32
    return %c0_i32, %c0_i32_0 : i32, i32
  }
  func.func @transform_2(%arg0: i32) -> (i32, i32) {
    %c0_i32 = arith.constant 0 : i32
    %c0_i32_0 = arith.constant 0 : i32
    %c0_i32_1 = arith.constant 0 : i32
    return %c0_i32, %c0_i32_0 : i32, i32
  }
  func.func @transform_3(%arg0: i32) -> (i32, i32) {
    %c0_i32 = arith.constant 0 : i32
    %c0_i32_0 = arith.constant 0 : i32
    %c0_i32_1 = arith.constant 0 : i32
    return %c0_i32, %c0_i32_0 : i32, i32
  }
  func.func @transform_4(%arg0: i32) -> (i32, i32, i32) {
    %c0_i32 = arith.constant 0 : i32
    %c0_i32_0 = arith.constant 0 : i32
    %c0_i32_1 = arith.constant 0 : i32
    %c0_i32_2 = arith.constant 0 : i32
    return %c0_i32, %c0_i32_0, %c0_i32_1 : i32, i32, i32
  }
  func.func @transform_5(%arg0: i32) -> (i32, i32) {
    %c0_i32 = arith.constant 0 : i32
    %c0_i32_0 = arith.constant 0 : i32
    %c0_i32_1 = arith.constant 0 : i32
    return %c0_i32, %c0_i32_0 : i32, i32
  }
  func.func @transform_6(%arg0: i32) -> (i32, i32) {
    %c0_i32 = arith.constant 0 : i32
    %c0_i32_0 = arith.constant 0 : i32
    %c0_i32_1 = arith.constant 0 : i32
    return %c0_i32, %c0_i32_0 : i32, i32
  }
  func.func @transform_7(%arg0: i32) -> (i32, i32) {
    %c0_i32 = arith.constant 0 : i32
    %c0_i32_0 = arith.constant 0 : i32
    return %c0_i32, %arg0 : i32, i32
  }
}

</mosaic_0001>

<bundles_post_ra>
// kernel: tpu_custom_call.1
= control target key start
LH: loop header
LB: loop body
LE: loop exit
PB: predicated region body
PF: predicated region fallthrough
CT: control target
= control target key end

     0   :  { %s5712_s0 = inlined_call_operand.hbm [shape: f32[4,4096], index: 0, kind: input, shape index: {}]   ;;  %s5713_s1 = inlined_call_operand.vmem [shape: f32[1,3], index: 1, kind: input, shape index: {}]   ;;  %s5714_s2 = inlined_call_operand.vmem [shape: f32[32,4], index: 2, kind: input, shape index: {}]   ;;  %s5715_s3 = inlined_call_operand.vmem [shape: f32[32,3], index: 3, kind: input, shape index: {}]   ;;  %s5716_s4 = inlined_call_operand.vmem [shape: f32[2,32,32], index: 4, kind: input, shape index: {}]   ;;  %s5717_s5 = inlined_call_operand.vmem [shape: f32[1,32], index: 5, kind: input, shape index: {}]   ;;  %s5718_s6 = inlined_call_operand.<no memory space> [shape: f32[1,1], index: 6, kind: input, shape index: {}]   ;;  %s5719_s7 = inlined_call_operand.hbm [shape: f32[1,4096], index: 7, kind: output, shape index: {}]  }
   0x1   :  { %v12_v0 = vstv %s5718_s6 }
   0x2   :  { %13 = vst [vmem:[#allocation2] sm:$0x1] %v12_v0 }
   0x3   :  { %14 = vsyncpa [#allocation4], 0 }
   0x4   :  { %16 = vsyncpa [#allocation4 + $0x1], 0 }
   0x5   :  { %17 = vsyncpa [#allocation5], 0 }
   0x6   :  { %19 = vsyncpa [#allocation5 + $0x1], 0  ;;  %s4313_s26 = smov 0   ;;  %s4315_s27 = smov 0  }
   0x7   :  { %s4317_s28 = smov 0   ;;  %s4319_s29 = smov 0  }
   0x8 LB: > { %s4334_s6 = sadd.s32 4294967295, %s4264_s29   ;;  %s3979_s30 = sadd.s32 4294967294, %s4264_s29   ;;  %s4264_s29 = sphi %s4319_s29, %s5728_s29   ;;  %s4260_s28 = sphi %s4317_s28, %s5727_s28   ;;  %s4256_s27 = sphi %s4315_s27, %s5726_s27   ;;  %s4252_s26 = sphi %s4313_s26, %s5725_s26  }
   0x9   : > { %s4338_s8 = sadd.s32 1, %s4264_s29   ;;  %s32_s9 = sadd.s32 1, %s4260_s28 }
   0xa   : > { %s29_s10 = ssub.s32 %s4264_s29, %s4338_s8  ;;  %p39_p0 = scmp.ne.s32.totalorder %s4260_s28, %s4256_s27 }
   0xb   : > { %p30_p1 = scmp.eq.s32.totalorder %s29_s10, 0  ;;  %p40_p2 = scmp.eq.s32.totalorder %s4264_s29, 0 }
   0xc   : > { %p45_p3 = scmp.ne.s32.totalorder %s4256_s27, %s4252_s26  ;;  %p46_p4 = scmp.eq.s32.totalorder %s4334_s6, 0 }
   0xd   : > { %s4350_s11 = scalar_select %p30_p1, %s4260_s28, %s32_s9  }
   0xe   : > { %p4352_p5 = por %p40_p2, %p39_p0  ;;  %p4356_p6 = por %p46_p4, %p45_p3 }
   0xf   : > { %p195_p7 = scmp.eq.s32.totalorder %s4334_s6, 7  ;;  %p201_p8 = scmp.eq.s32.totalorder %s3979_s30, 7 }
  0x10   : > { %p4009_p9 = scmp.lt.s32.totalorder %s4264_s29, 8  ;;  %s239_s16 = sand.u32 1, %s4260_s28  }
  0x11   : > { %p4362_p10 = por %p195_p7, %p39_p0  ;;  %p4366_p11 = por %p201_p8, %p45_p3 }
  0x12   : > { %s3996_s17 = sshll.u32 %s4264_s29, 4  ;;  %s3982_s18 = sshll.u32 %s239_s16, 4 }
  0x13   : > { %s248_s21 = scalar_lea.hbm %s5712_s0, %s3996_s17  ;;  %s243_s23 = scalar_lea.vmem [#allocation3], %s3982_s18 }
  0x14   : > { %s250_s22 = sshll.u32 %s248_s21, 4  ;;  %s252_s24 = sshll.u32 %s243_s23, 4  ;;  %s251_s22 = int_to_ptr.hbm [resolvable:$true] %s250_s22  ;;  %s253_s24 = int_to_ptr.vmem [resolvable:$true] %s252_s24 }
  0x15   : > { %p4377_p12 = pnand %p4009_p9, %p4352_p5  ;;  %p3985_p13 = scmp.ge.s32.totalorder %s4264_s29, 1 }
  0x16   : > { %p257_p0 = scmp.lt.s32.totalorder %s4264_s29, 9  ;;  %s240_s30 = scalar_lea.sflag [#allocation4], %s239_s16 }
  0x17   : > { %s4168_s9 = sshra.s32 %s251_s22, 4  ;;  %p4172_p2 = pneg %p4377_p12  ;;  %s4169_s9 = int_to_ptr.hbm [resolvable:$true] %s4168_s9 }
  0x18   : > { %s4170_s10 = scalar_lea.hbm %s4169_s9, 16  ;;  %s4175_s12 = scalar_lea.hbm %s5712_s0, 128 }
  0x19   : > { %p4171_p1 = scmp.ne.s32.totalorder %s4169_s9, %s4170_s10  ;;  %p4176_p5 = scmp.lt.s32.totalorder %s4169_s9, %s5712_s0 }
  0x1a   : > { %p4177_p7 = scmp.lt.s32.totalorder %s4175_s12, %s4170_s10 }
  0x1b   : > { %p4173_p3 = pnand %p4172_p2, %p4171_p1 }
  0x1c   : > { %p4178_p8 = por %p4177_p7, %p4176_p5 }
  0x1d   : > { %p4174_p4 = pneg %p4173_p3 }
  0x1f   : > { %p4179_p9 = pnand %p4178_p8, %p4174_p4 }
  0x21   : > { %4182 = shalt.err (!%p4179_p9)
}
  0x22   : > { %4004 = dma.hbm_to_vmem [thread:$0]  (!%p4377_p12), %s251_s22, 256, %s253_s24, %s240_s30  }
  0x23   : > { %p258_p1 = pnand %p3985_p13, %p257_p0 }
  0x24   : > { %s4398_s16 = sand.u32 (!%p258_p1), 1, %s4256_s27  }
  0x25   : > { %261 = sbr.rel (%p258_p1) target bundleno = 980 (0x3d4), region = 48  ;;  %s3986_s21 = sshll.u32 (!%p258_p1), %s4398_s16, 4 }
  0x26   : > { %s264_s23 = scalar_lea.sflag (!%p258_p1), [#allocation4], %s4398_s16  ;;  %s4402_s9 = scalar_lea.vmem (!%p258_p1), [#allocation3], %s3986_s21 }
  0x2a   : > { %4243 = dma.done.wait (%p4356_p6), %s264_s23, 256  }
  0x2b   : > { %4245 = vsyncadd (%p4356_p6), %s264_s23, 4294967040  ;;  %v4266_v1 = vmov 2   ;;  %v4267_v2 = vmov 0   ;;  %v306_v3 = vld [vmem:[%s5714_s2 + $0x18] sm:$0xff]  ;;  %v305_v4 = vld [vmem:[%s5714_s2 + $0x10] sm:$0xff]  ;;  %v4268_v6 = vmov 1  }
  0x2c   : > { %4051 = vset.pattern.permute.xlu2 %v4266_v1  ;;  %4049 = vset.pattern.permute.xlu1 %v4267_v2  ;;  %v304_v5 = vld [vmem:[%s5714_s2 + $0x8] sm:$0xff]  ;;  %v4269_v7 = vmov 3   ;;  %v303_v8 = vld [vmem:[%s5714_s2] sm:$0xff]  ;;  %v541_v12 = vld [vmem:[%s5715_s3 + $0x18] sm:$0xff]  ;;  %vm685_vm0 = vcmask 261120   ;;  %s3987_s12 = sshll.u32 %s4398_s16, 2 }
  0x2d   : > { %4047 = vset.pattern.permute.xlu0 %v4267_v2  ;;  %431 = vperm.xlu2 %4051, %v306_v3   ;;  %v307_v9 = vld [vmem:[%s5713_s1] sm:$0x1]  ;;  %v539_v13 = vld [vmem:[%s5715_s3 + $0x8] sm:$0xff]  ;;  %v540_v14 = vld [vmem:[%s5715_s3 + $0x10] sm:$0xff]  ;;  %s3993_s19 = sshll.u32 %s4334_s6, 2  ;;  %vm3881_vm1 = vcmask 1040384  }
  0x2e   : > { %325 = vperm.xlu0 %4047, %v306_v3   ;;  %320 = vperm.xlu1 %4049, %v305_v4   ;;  %v578_v10 = vmul.f32 0.5, %v307_v9  ;;  %v538_v15 = vld [vmem:[%s5715_s3] sm:$0xff]  ;;  %s3904_s23 = scalar_lea.hbm %s5719_s7, %s3993_s19  ;;  %vm3883_vm2 = vcmask 1042434   ;;  %s298_s22 = scalar_lea.vmem [#allocation6], %s3987_s12  ;;  %vm3885_vm3 = vcmask 1041408  }
  0x2f   : > { %v302_v19 = vld [vmem:[%s4402_s9 + $0x8] sm:$0xff]  ;;  %v4509_v55 = vld [vmem:[%s4402_s9] sm:$0xff]  ;;  %s3906_s24 = sshll.u32 %s298_s22, 4  ;;  %s3908_s6 = sshll.u32 %s3904_s23, 4  ;;  %s3907_s24 = int_to_ptr.vmem [resolvable:$true] %s3906_s24  ;;  %s3909_s6 = int_to_ptr.hbm [resolvable:$true] %s3908_s6 }
  0x30   : > { %v580_v11 = vperm.slane %v578_v10, 0  ;;  %v436_v21 = vperm.slane %v302_v19, 2  ;;  %v437_v22 = vperm.slane %v302_v19, 6  ;;  %v332_v23 = vperm.slane %v302_v19, 0  ;;  %s3894_s25 = scalar_lea.sflag [#allocation5], %s4398_s16  ;;  %s4212_s30 = sshra.s32 %s3909_s6, 4  ;;  %s4213_s30 = int_to_ptr.hbm [resolvable:$true] %s4212_s30 }
  0x31   : > { %v333_v24 = vperm.slane %v302_v19, 4  ;;  %v376_v26 = vperm.slane %v302_v19, 1  ;;  %v377_v27 = vperm.slane %v302_v19, 5  ;;  %v496_v35 = vperm.slane %v302_v19, 3  ;;  %s4214_s13 = scalar_lea.hbm %s4213_s30, 4  ;;  %s4218_s17 = scalar_lea.hbm %s5719_s7, 32 }
  0x32   : > { %v4462_v28 = vperm.slane %v436_v21, 2  ;;  %v4464_v29 = vperm.slane %v437_v22, 2  ;;  %v4466_v30 = vperm.slane %v332_v23, 0  ;;  %v497_v36 = vperm.slane %v302_v19, 7  ;;  %p4215_p6 = scmp.ne.s32.totalorder %s4213_s30, %s4214_s13  ;;  %p4219_p0 = scmp.lt.s32.totalorder %s4213_s30, %s5719_s7 }
  0x33   : > { %v4468_v31 = vperm.slane %v333_v24, 0  ;;  %v4472_v33 = vperm.slane %v376_v26, 1  ;;  %v4474_v34 = vperm.slane %v377_v27, 1  ;;  %v4492_v45 = vperm.slane %v496_v35, 3  ;;  %p4220_p2 = scmp.lt.s32.totalorder %s4218_s17, %s4214_s13 }
  0x34   : > { %v4494_v46 = vperm.slane %v497_v36, 3  ;;  %v374_v58 = vperm.slane %v4509_v55, 1  ;;  %v330_v0 = vperm.slane %v4509_v55, 0  ;;  %v375_v21 = vperm.slane %v4509_v55, 5  ;;  %p4216_p12 = pnand %p4215_p6, %p4362_p10 }
  0x35   : > { %4052 = vset.pattern.permute.xlu2 %v4267_v2  ;;  %v494_v22 = vperm.slane %v4509_v55, 3  ;;  %p4221_p3 = por %p4220_p2, %p4219_p0 }
  0x36   : > { %4048 = vset.pattern.permute.xlu0 %v4268_v6  ;;  %4050 = vset.pattern.permute.xlu1 %v4268_v6  ;;  %p4217_p13 = pneg %p4216_p12 }
  0x37   : > { %371 = vperm.xlu0 %4048, %v306_v3   ;;  %367 = vperm.xlu1 %4050, %v305_v4  }
  0x38   : > { %315 = vperm.xlu2 %4052, %v304_v5   ;;  %p4222_p4 = pnand %p4221_p3, %p4217_p13 }
  0x3f   : > { %4054 = vset.pattern.permute.xlu0 %v4269_v7  ;;  %363 = vperm.xlu1 %4050, %v304_v5  }
  0x40   : > { %4053 = vset.pattern.permute.xlu2 %v4266_v1  ;;  %491 = vperm.xlu0 %4054, %v306_v3   ;;  %v434_v3 = vperm.slane %v4509_v55, 2 }
  0x41   : > { %427 = vperm.xlu2 %4053, %v305_v4  }
  0x47   : > { %4055 = vset.pattern.permute.xlu1 %v4267_v2 }
  0x48   : > { %4059 = vset.pattern.permute.xlu0 %v4266_v1  ;;  %310 = vperm.xlu1 %4055, %v303_v8  }
  0x49   : > { %4056 = vset.pattern.permute.xlu2 %v4268_v6  ;;  %419 = vperm.xlu0 %4059, %v303_v8  }
  0x4a   : > { %359 = vperm.xlu2 %4056, %v303_v8  }
  0x50   : > { %4057 = vset.pattern.permute.xlu1 %v4266_v1 }
  0x51   : > { %4062 = vset.pattern.permute.xlu0 %v4267_v2  ;;  %423 = vperm.xlu1 %4057, %v304_v5  }
  0x52   : > { %4058 = vset.pattern.permute.xlu2 %v4269_v7  ;;  %582 = vperm.xlu0 %4062, %v580_v11  }
  0x53   : > { %487 = vperm.xlu2 %4058, %v305_v4   ;;  %v4520_v4 = vperm.slane %v374_v58, 1 }
  0x59   : > { %4060 = vset.pattern.permute.xlu1 %v4269_v7 }
  0x5a   : > { %483 = vperm.xlu1 %4060, %v304_v5   ;;  %4066 = vset.pattern.permute.xlu0 %v4268_v6 }
  0x5b   : > { %4061 = vset.pattern.permute.xlu2 %v4267_v2  ;;  %674 = vperm.xlu0 %4066, %v539_v13  }
  0x5c   : > { %559 = vperm.xlu2 %4061, %v541_v12  }
  0x62   : > { %479 = vperm.xlu1 %4060, %v303_v8  }
  0x63   : > { %4069 = vset.pattern.permute.xlu0 %v4266_v1 }
  0x64   : > { %554 = vperm.xlu2 %4061, %v540_v14   ;;  %1904 = vperm.xlu0 %4069, %v539_v13  }
  0x6a   : > { %4063 = vset.pattern.permute.xlu1 %v4267_v2 }
  0x6b   : > { %549 = vperm.xlu1 %4063, %v539_v13   ;;  %v331_v13 = vperm.slane %v4509_v55, 4 }
  0x6c   : > { %544 = vperm.xlu2 %4061, %v538_v15   ;;  %4071 = vset.pattern.permute.xlu0 %v4267_v2 }
  0x73   : > { %4064 = vset.pattern.permute.xlu1 %v4268_v6 }
  0x74   : > { %4065 = vset.pattern.permute.xlu2 %v4268_v6  ;;  %682 = vperm.xlu1 %4064, %v541_v12  }
  0x75   : > { %678 = vperm.xlu2 %4065, %v540_v14  }
  0x7c   : > { %670 = vperm.xlu1 %4064, %v538_v15  }
  0x7d   : > { %1811 = vperm.xlu2 %4065, %v580_v11  }
  0x84   : > { %4067 = vset.pattern.permute.xlu1 %v4266_v1 }
  0x85   : > { %4068 = vset.pattern.permute.xlu2 %v4266_v1  ;;  %1912 = vperm.xlu1 %4067, %v541_v12  }
  0x86   : > { %1908 = vperm.xlu2 %4068, %v540_v14   ;;  %v4533_v14 = vperm.slane %v330_v0, 0 }
  0x87   : > { %v4450_v16 = vpop.permute.xlu2 %431 }
  0x88   : > { %v460_v39 = vmul.f32 %v4462_v28, %v4450_v16  ;;  %v461_v40 = vmul.f32 %v4464_v29, %v4450_v16 }
  0x8d   : > { %1900 = vperm.xlu1 %4067, %v538_v15  }
  0x8e   : > { %3040 = vperm.xlu2 %4068, %v580_v11  }
  0x92   : > { %v4452_v17 = vpop.permute.xlu2 %315 }
  0x93   : > { %v348_v8 = vmul.f32 %v4466_v30, %v4452_v17  ;;  %v349_v9 = vmul.f32 %v4468_v31, %v4452_v17 }
  0x95   : > { %4070 = vset.pattern.permute.xlu1 %v4267_v2 }
  0x9b   : > { %v4455_v18 = vpop.permute.xlu2 %427 }
  0x9c   : > { %v456_v51 = vmul.f32 %v4462_v28, %v4455_v18  ;;  %v457_v52 = vmul.f32 %v4464_v29, %v4455_v18 }
  0xa0   : > { %v4458_v20 = vpop.permute.xlu0 %325  ;;  %v4460_v25 = vpop.permute.xlu1 %320 }
  0xa1   : > { %v356_v37 = vmul.f32 %v4466_v30, %v4458_v20  ;;  %v357_v38 = vmul.f32 %v4468_v31, %v4458_v20  ;;  %v352_v47 = vmul.f32 %v4466_v30, %v4460_v25  ;;  %v353_v48 = vmul.f32 %v4468_v31, %v4460_v25 }
  0xa2   : > { %v354_v26 = vmul.f32 %v4533_v14, %v4458_v20 }
  0xa4   : > { %v4470_v32 = vpop.permute.xlu2 %359 }
  0xa9   : > { %v4484_v41 = vpop.permute.xlu0 %371  ;;  %v4490_v44 = vpop.permute.xlu1 %367 }
  0xaa   : > { %v400_v42 = vmul.f32 %v4472_v33, %v4484_v41  ;;  %v401_v43 = vmul.f32 %v4474_v34, %v4484_v41  ;;  %v396_v49 = vmul.f32 %v4472_v33, %v4490_v44  ;;  %v397_v50 = vmul.f32 %v4474_v34, %v4490_v44 }
  0xab   : > { %v398_v27 = vmul.f32 %v4520_v4, %v4484_v41 }
  0xac   : > { %v416_v53 = vadd.f32 %v400_v42, %v356_v37  ;;  %v417_v54 = vadd.f32 %v401_v43, %v357_v38  ;;  %v412_v56 = vadd.f32 %v396_v49, %v352_v47  ;;  %v413_v57 = vadd.f32 %v397_v50, %v353_v48 }
  0xad   : > { %v4512_v59 = vpop.permute.xlu2 %487  ;;  %v394_v37 = vmul.f32 %v4520_v4, %v4490_v44  ;;  %v350_v47 = vmul.f32 %v4533_v14, %v4460_v25  ;;  %v4558_v48 = vperm.slane %v375_v21, 1  ;;  %v4560_v49 = vperm.slane %v331_v13, 0 }
  0xae   : > { %v476_v60 = vadd.f32 %v460_v39, %v416_v53  ;;  %v477_v61 = vadd.f32 %v461_v40, %v417_v54  ;;  %v516_v62 = vmul.f32 %v4492_v45, %v4512_v59  ;;  %v517_v63 = vmul.f32 %v4494_v46, %v4512_v59 }
  0xaf   : > { %v472_v1 = vadd.f32 %v456_v51, %v412_v56  ;;  %v473_v2 = vadd.f32 %v457_v52, %v413_v57  ;;  %v435_v39 = vperm.slane %v4509_v55, 6  ;;  %v4550_v40 = vperm.slane %v434_v3, 2 }
  0xb0   : > { %v414_v50 = vadd.f32 %v398_v27, %v354_v26  ;;  %v4562_v51 = vperm.slane %v494_v22, 3  ;;  %v388_v53 = vmul.f32 %v4472_v33, %v4470_v32  ;;  %v389_v54 = vmul.f32 %v4474_v34, %v4470_v32 }
  0xb1   : > { %v4522_v5 = vpop.permute.xlu1 %363  ;;  %v532_v6 = vadd.f32 %v516_v62, %v472_v1  ;;  %v533_v7 = vadd.f32 %v517_v63, %v473_v2  ;;  %v454_v52 = vmul.f32 %v4550_v40, %v4455_v18  ;;  %v410_v56 = vadd.f32 %v394_v37, %v350_v47 }
  0xb2   : > { %v392_v10 = vmul.f32 %v4472_v33, %v4522_v5  ;;  %v393_v11 = vmul.f32 %v4474_v34, %v4522_v5  ;;  %v492_v12 = vpop.permute.xlu0 %491  ;;  %v4570_v57 = vperm.slane %v435_v39, 2  ;;  %v458_v58 = vmul.f32 %v4550_v40, %v4450_v16 }
  0xb3   : > { %v520_v15 = vmul.f32 %v4492_v45, %v492_v12  ;;  %v521_v19 = vmul.f32 %v4494_v46, %v492_v12  ;;  %v399_v0 = vmul.f32 %v4558_v48, %v4484_v41  ;;  %v518_v33 = vmul.f32 %v4562_v51, %v492_v12 }
  0xb4   : > { %v4539_v23 = vadd.f32 %v392_v10, %v348_v8  ;;  %v4541_v24 = vadd.f32 %v393_v11, %v349_v9  ;;  %v395_v2 = vmul.f32 %v4558_v48, %v4490_v44  ;;  %v474_v3 = vadd.f32 %v458_v58, %v414_v50 }
  0xb5   : > { %v536_v35 = vadd.f32 %v520_v15, %v476_v60  ;;  %v537_v36 = vadd.f32 %v521_v19, %v477_v61  ;;  %v355_v60 = vmul.f32 %v4560_v49, %v4458_v20  ;;  %v495_v61 = vperm.slane %v4509_v55, 7 }
  0xb6   : > { %v560_v38 = vpop.permute.xlu2 %559  ;;  %v514_v55 = vmul.f32 %v4562_v51, %v4512_v59  ;;  %v470_v11 = vadd.f32 %v454_v52, %v410_v56  ;;  %v534_v19 = vadd.f32 %v518_v33, %v474_v3  ;;  %v459_v26 = vmul.f32 %v4570_v57, %v4450_v16 }
  0xb7   : > { %v4552_v42 = vadd.f32 %v560_v38, %v536_v35  ;;  %v4554_v43 = vadd.f32 %v560_v38, %v537_v36  ;;  %v4590_v13 = vperm.slane %v495_v61, 3  ;;  %v415_v15 = vadd.f32 %v399_v0, %v355_v60 }
  0xb8   : > { %v455_v27 = vmul.f32 %v4570_v57, %v4455_v18  ;;  %v530_v36 = vadd.f32 %v514_v55, %v470_v11  ;;  %v574_v37 = vadd.f32 %v560_v38, %v534_v19  ;;  %v387_v61 = vmul.f32 %v4558_v48, %v4470_v32 }
  0xb9   : > { %v515_v47 = vmul.f32 %v4590_v13, %v4512_v59  ;;  %v386_v59 = vmul.f32 %v4520_v4, %v4470_v32  ;;  %v390_v11 = vmul.f32 %v4520_v4, %v4522_v5  ;;  %v346_v19 = vmul.f32 %v4533_v14, %v4452_v17 }
  0xba   : > { %v311_v62 = vpop.permute.xlu1 %310 }
  0xbb   : > { %v420_v63 = vpop.permute.xlu0 %419  ;;  %v344_v34 = vmul.f32 %v4466_v30, %v311_v62  ;;  %v345_v1 = vmul.f32 %v4468_v31, %v311_v62  ;;  %v351_v30 = vmul.f32 %v4560_v49, %v4460_v25  ;;  %v519_v25 = vmul.f32 %v4590_v13, %v492_v12 }
  0xbc   : > { %v448_v8 = vmul.f32 %v4462_v28, %v420_v63  ;;  %v449_v20 = vmul.f32 %v4464_v29, %v420_v63  ;;  %v342_v0 = vmul.f32 %v4533_v14, %v311_v62 }
  0xbd   : > { %v404_v9 = vadd.f32 %v388_v53, %v344_v34  ;;  %v405_v10 = vadd.f32 %v389_v54, %v345_v1  ;;  %v411_v35 = vadd.f32 %v395_v2, %v351_v30  ;;  %v391_v30 = vmul.f32 %v4558_v48, %v4522_v5 }
  0xbe   : > { %v555_v41 = vpop.permute.xlu2 %554  ;;  %v402_v55 = vadd.f32 %v386_v59, %v342_v0  ;;  %v665_v0 = vld [vmem:[%s5716_s4] sm:$0xff] }
  0xbf   : > { %v4592_v31 = vadd.f32 %v555_v41, %v532_v6  ;;  %v4594_v44 = vadd.f32 %v555_v41, %v533_v7  ;;  %v4596_v21 = vadd.f32 %v448_v8, %v404_v9  ;;  %v4598_v22 = vadd.f32 %v449_v20, %v405_v10 }
  0xc0   : > { %v475_v6 = vadd.f32 %v459_v26, %v415_v15  ;;  %v570_v7 = vadd.f32 %v555_v41, %v530_v36  ;;  %v471_v53 = vadd.f32 %v455_v27, %v411_v35  ;;  %v446_v8 = vmul.f32 %v4550_v40, %v420_v63 }
  0xc1   : > { %v447_v20 = vmul.f32 %v4570_v57, %v420_v63  ;;  %v347_v63 = vmul.f32 %v4560_v49, %v4452_v17 }
  0xc2   : > { %v535_v16 = vadd.f32 %v519_v25, %v475_v6  ;;  %v531_v58 = vadd.f32 %v515_v47, %v471_v53  ;;  %v462_v27 = vadd.f32 %v446_v8, %v402_v55  ;;  %v687_v55 = vsel %vm685_vm0, %v665_v0, 0 }
  0xc3   : > { %v4605_v39 = vpop.permute.xlu1 %423 }
  0xc4   : > { %v453_v50 = vmul.f32 %v4464_v29, %v4605_v39  ;;  %v4611_v52 = vpop.permute.xlu0 %582  ;;  %v4616_v56 = vadd.f32 %v560_v38, %v535_v16  ;;  %v4618_v60 = vadd.f32 %v555_v41, %v531_v58  ;;  %v450_v25 = vmul.f32 %v4550_v40, %v4605_v39 }
  0xc5   : > { %v597_v18 = vmul.f32 %v4611_v52, %v574_v37  ;;  %v593_v12 = vmul.f32 %v4611_v52, %v570_v7  ;;  %v451_v5 = vmul.f32 %v4570_v57, %v4605_v39 }
  0xc6   : > { %v469_v54 = vadd.f32 %v453_v50, %v4541_v24  ;;  %v598_v29 = vmul.f32 %v4611_v52, %v4616_v56  ;;  %v343_v24 = vmul.f32 %v4560_v49, %v311_v62  ;;  %v594_v1 = vmul.f32 %v4611_v52, %v4618_v60 }
  0xc7   : > { %4072 = vtanh.f32 %v597_v18  ;;  %v406_v49 = vadd.f32 %v390_v11, %v346_v19  ;;  %v4674_v18 = vpop.permute.xlu2 %544  ;;  %v4705_v19 = vand.u32 4294901760, %v687_v55 }
  0xc8   : > { %4074 = vtanh.f32 %v593_v12  ;;  %v403_v9 = vadd.f32 %v387_v61, %v343_v24 }
  0xc9   : > { %4076 = vtanh.f32 %v598_v29  ;;  %v466_v58 = vadd.f32 %v450_v25, %v406_v49 }
  0xca   : > { %4078 = vtanh.f32 %v594_v1  ;;  %v463_v35 = vadd.f32 %v447_v20, %v403_v9 }
  0xcc   : > { %v4628_v33 = vpop.permute.xlu1 %483 }
  0xcd   : > { %v4073_v38 = vpop.eup %4072  ;;  %v513_v34 = vmul.f32 %v4494_v46, %v4628_v33  ;;  %v510_v47 = vmul.f32 %v4562_v51, %v4628_v33 }
  0xce   : > { %v4075_v2 = vpop.eup %4074  ;;  %v629_v3 = vmul.f32 0.5, %v4073_v38 }
  0xcf   : > { %v625_v32 = vmul.f32 0.5, %v4075_v2  ;;  %v4636_v10 = vadd.f32 %v513_v34, %v469_v54  ;;  %v4077_v4 = vpop.eup %4076  ;;  %v526_v1 = vadd.f32 %v510_v47, %v466_v58 }
  0xd0   : > { %v645_v62 = vadd.f32 0.5, %v629_v3  ;;  %v4079_v57 = vpop.eup %4078 }
  0xd1   : > { %v641_v41 = vadd.f32 0.5, %v625_v32  ;;  %v626_v24 = vmul.f32 0.5, %v4079_v57 }
  0xd2   : > { %v661_v15 = vmul.f32 %v645_v62, %v574_v37  ;;  %v407_v37 = vadd.f32 %v391_v30, %v347_v63 }
  0xd3   : > { %v657_v26 = vmul.f32 %v641_v41, %v570_v7  ;;  %v642_v41 = vadd.f32 0.5, %v626_v24 }
  0xd4   : > { %v4648_v36 = vpop.permute.xlu1 %479  ;;  %v4650_v6 = vand.u32 4294901760, %v661_v15  ;;  %v467_v29 = vadd.f32 %v451_v5, %v407_v37 }
  0xd5   : > { %v506_v14 = vmul.f32 %v4562_v51, %v4648_v36  ;;  %v507_v17 = vmul.f32 %v4590_v13, %v4648_v36  ;;  %v509_v48 = vmul.f32 %v4494_v46, %v4648_v36  ;;  %v4662_v40 = vand.u32 4294901760, %v657_v26 }
  0xd6   : > { %711 = vmatpush.msra.mxu0 %v4650_v6  ;;  %862 = vmatpush.msra.mxu3 %v4650_v6  ;;  %v4665_v7 = vsub.f32 %v661_v15, %v4650_v6  ;;  %v511_v46 = vmul.f32 %v4590_v13, %v4628_v33  ;;  %v630_v51 = vmul.f32 0.5, %v4077_v4  ;;  %v4710_v4 = vsub.f32 %v687_v55, %v4705_v19 }
  0xd7   : > { %v522_v50 = vadd.f32 %v506_v14, %v462_v27  ;;  %v523_v16 = vadd.f32 %v507_v17, %v463_v35  ;;  %v4670_v53 = vadd.f32 %v509_v48, %v4598_v22  ;;  %v4679_v12 = vsub.f32 %v657_v26, %v4662_v40  ;;  %v666_v14 = vld [vmem:[%s5716_s4 + $0x8] sm:$0xff] }
  0xd8   : > { %713 = vmatpush.msra.mxu0 %v4662_v40  ;;  %818 = vmatpush.msra.mxu2 %v4665_v7  ;;  %v765_v54 = vand.u32 4294901760, %v4665_v7  ;;  %v527_v2 = vadd.f32 %v511_v46, %v467_v29  ;;  %v646_v20 = vadd.f32 0.5, %v630_v51  ;;  %v658_v26 = vmul.f32 %v642_v41, %v4618_v60 }
  0xd9   : > { %v562_v22 = vadd.f32 %v4674_v18, %v522_v50  ;;  %v563_v59 = vadd.f32 %v4674_v18, %v523_v16  ;;  %864 = vmatpush.msra.mxu3 %v4662_v40  ;;  %v771_v61 = vand.u32 4294901760, %v4679_v12  ;;  %v690_v60 = vsel %vm685_vm0, %v666_v14, 0 }
  0xda   : > { %821 = vmatpush.msra.mxu2 %v4679_v12  ;;  %v766_v13 = vsub.f32 %v4665_v7, %v765_v54  ;;  %v662_v63 = vmul.f32 %v646_v20, %v4616_v56  ;;  %v4717_v56 = vand.u32 4294901760, %v658_v26  ;;  %v4721_v47 = vand.u32 4294901760, %v4710_v4  ;;  %v668_v7 = vld [vmem:[%s5716_s4 + $0x18] sm:$0xff] }
  0xdb   : > { %v585_v38 = vmul.f32 %v4611_v52, %v562_v22  ;;  %v586_v34 = vmul.f32 %v4611_v52, %v563_v59  ;;  %v772_v8 = vsub.f32 %v4679_v12, %v771_v61  ;;  %v4731_v0 = vand.u32 4294901760, %v690_v60 }
  0xdc   : > { %v767_v3 = vand.u32 4294901760, %v766_v13  ;;  %v4712_v5 = vand.u32 4294901760, %v662_v63  ;;  %v4729_v13 = vsub.f32 %v658_v26, %v4717_v56  ;;  %v696_v12 = vsel %vm685_vm0, %v668_v7, 0 }
  0xdd   : > { %4080 = vtanh.f32 %v585_v38  ;;  %v4698_v32 = vpop.permute.xlu1 %549  ;;  %v773_v11 = vand.u32 4294901760, %v772_v8 }
  0xde   : > { %4082 = vtanh.f32 %v586_v34  ;;  %v566_v9 = vadd.f32 %v4698_v32, %v526_v1  ;;  %v567_v62 = vadd.f32 %v4698_v32, %v527_v2  ;;  %768 = vmatpush.msra.mxu1 %v767_v3  ;;  %v4724_v50 = vsub.f32 %v662_v63, %v4712_v5 }
  0xdf   : > { %v721_v1 = vsub.f32 %v4710_v4, %v4721_v47  ;;  %v1049_v20 = vand.u32 4294901760, %v4729_v13  ;;  %v508_v63 = vmul.f32 %v4492_v45, %v4648_v36 }
  0xe0   : > { %v589_v30 = vmul.f32 %v4611_v52, %v566_v9  ;;  %v590_v15 = vmul.f32 %v4611_v52, %v567_v62  ;;  %774 = vmatpush.msra.mxu1 %v773_v11 }
  0xe2   : > { %4084 = vtanh.f32 %v589_v30  ;;  %v4760_v30 = vand.u32 4294901760, %v721_v1 }
  0xe3   : > { %v4081_v27 = vpop.eup %4080  ;;  %4086 = vtanh.f32 %v590_v15 }
  0xe4   : > { %v4083_v35 = vpop.eup %4082  ;;  %v617_v25 = vmul.f32 0.5, %v4081_v27  ;;  %v1050_v27 = vsub.f32 %v4729_v13, %v1049_v20 }
  0xe5   : > { %v618_v17 = vmul.f32 0.5, %v4083_v35 }
  0xe6   : > { %v633_v48 = vadd.f32 0.5, %v617_v25 }
  0xe7   : > { %v634_v49 = vadd.f32 0.5, %v618_v17 }
  0xe8   : > { %v4085_v37 = vpop.eup %4084  ;;  %v649_v57 = vmul.f32 %v633_v48, %v562_v22  ;;  %v452_v22 = vmul.f32 %v4462_v28, %v4605_v39  ;;  %v4748_v28 = vsub.f32 %v690_v60, %v4731_v0  ;;  %v667_v39 = vld [vmem:[%s5716_s4 + $0x10] sm:$0xff]  ;;  %v524_v60 = vadd.f32 %v508_v63, %v4596_v21 }
  0xe9   : > { %v4087_v16 = vpop.eup %4086  ;;  %v621_v46 = vmul.f32 0.5, %v4085_v37  ;;  %v650_v51 = vmul.f32 %v634_v49, %v563_v59  ;;  %v1043_v59 = vand.u32 4294901760, %v4724_v50 }
  0xea   : > { %v622_v58 = vmul.f32 0.5, %v4087_v16  ;;  %v4726_v29 = vand.u32 4294901760, %v649_v57  ;;  %v468_v41 = vadd.f32 %v452_v22, %v4539_v23  ;;  %v1051_v16 = vand.u32 4294901760, %v1050_v27 }
  0xeb   : > { %v637_v24 = vadd.f32 0.5, %v621_v46  ;;  %v4735_v38 = vand.u32 4294901760, %v650_v51  ;;  %v1044_v15 = vsub.f32 %v4724_v50, %v1043_v59  ;;  %v599_v22 = vmul.f32 %v4611_v52, %v4552_v42 }
  0xec   : > { %v638_v34 = vadd.f32 0.5, %v622_v58  ;;  %v4741_v3 = vsub.f32 %v649_v57, %v4726_v29  ;;  %v4818_v1 = vadd.f32 %v4674_v18, %v524_v60 }
  0xed   : > { %v653_v2 = vmul.f32 %v637_v24, %v566_v9  ;;  %v4745_v55 = vsub.f32 %v650_v51, %v4735_v38  ;;  %v512_v9 = vmul.f32 %v4492_v45, %v4628_v33  ;;  %v693_v33 = vsel %vm685_vm0, %v667_v39, 0 }
  0xee   : > { %v654_v8 = vmul.f32 %v638_v34, %v567_v62  ;;  %v783_v26 = vand.u32 4294901760, %v4741_v3  ;;  %v4780_v45 = vand.u32 4294901760, %v4748_v28  ;;  %v1045_v17 = vand.u32 4294901760, %v1044_v15 }
  0xef   : > { %v4754_v11 = vand.u32 4294901760, %v653_v2  ;;  %v1061_v25 = vand.u32 4294901760, %v4745_v55  ;;  %v528_v14 = vadd.f32 %v512_v9, %v468_v41  ;;  %v4786_v49 = vand.u32 4294901760, %v693_v33 }
  0xf0   : > { %v4758_v62 = vand.u32 4294901760, %v654_v8  ;;  %v784_v57 = vsub.f32 %v4741_v3, %v783_v26  ;;  %v729_v51 = vsub.f32 %v4748_v28, %v4780_v45  ;;  %4088 = vtanh.f32 %v599_v22 }
  0xf1   : > { %715 = vmatpush.msra.mxu0 %v4754_v11  ;;  %866 = vmatpush.msra.mxu3 %v4754_v11  ;;  %v776_v23 = vsub.f32 %v653_v2, %v4754_v11  ;;  %v1062_v21 = vsub.f32 %v4745_v55, %v1061_v25  ;;  %v4815_v34 = vsub.f32 %v693_v33, %v4786_v49  ;;  %v4832_v9 = vand.u32 4294901760, %v696_v12 }
  0xf2   : > { %v4776_v35 = vsub.f32 %v654_v8, %v4758_v62  ;;  %v785_v2 = vand.u32 4294901760, %v784_v57  ;;  %v4824_v8 = vand.u32 4294901760, %v729_v51  ;;  %v587_v15 = vmul.f32 %v4611_v52, %v4818_v1 }
  0xf3   : > { %717 = vmatpush.msra.mxu0 %v4726_v29  ;;  %824 = vmatpush.msra.mxu2 %v776_v23  ;;  %v777_v36 = vand.u32 4294901760, %v776_v23  ;;  %v4830_v41 = vand.u32 4294901760, %v4815_v34 }
  0xf4   : > { %868 = vmatpush.msra.mxu3 %v4726_v29  ;;  %723 = vmatmul.f32.vlgmr.msra.gmra.mxu0 %v4760_v30  ;;  %v1055_v48 = vand.u32 4294901760, %v4776_v35 }
  0xf5   : > { %872 = vmatmul.f32.vlgmr.msra.gmra.mxu3 %v4721_v47  ;;  %909 = vmatpush.msrb.mxu0 %v765_v54  ;;  %v778_v37 = vsub.f32 %v776_v23, %v777_v36  ;;  %v4806_v54 = vadd.f32 %v4698_v32, %v528_v14  ;;  %v737_v63 = vsub.f32 %v4815_v34, %v4830_v41 }
  0xf6   : > { %1046 = vmatpush.msrb.mxu3 %v1045_v17  ;;  %827 = vmatpush.msra.mxu2 %v4741_v3  ;;  %v1056_v46 = vsub.f32 %v4776_v35, %v1055_v48  ;;  %v1063_v3 = vand.u32 4294901760, %v1062_v21  ;;  %v4847_v23 = vsub.f32 %v696_v12, %v4832_v9 }
  0xf7   : > { %830 = vmatmul.f32.vlgmr.msra.gmra.mxu2 %v4710_v4  ;;  %913 = vmatpush.msrb.mxu0 %v771_v61  ;;  %v779_v58 = vand.u32 4294901760, %v778_v37  ;;  %v595_v61 = vmul.f32 %v4611_v52, %v4592_v31  ;;  %v591_v39 = vmul.f32 %v4611_v52, %v4806_v54  ;;  %v4859_v33 = vand.u32 4294901760, %v737_v63 }
  0xf8   : > { %989 = vmatpush.msrb.mxu2 %v4712_v5  ;;  %1052 = vmatpush.msrb.mxu3 %v1051_v16  ;;  %v1057_v24 = vand.u32 4294901760, %v1056_v46 }
  0xf9   : > { %917 = vmatpush.msrb.mxu0 %v777_v36  ;;  %780 = vmatpush.msra.mxu1 %v779_v58  ;;  %4090 = vtanh.f32 %v595_v61 }
  0xfa   : > { %991 = vmatpush.msrb.mxu2 %v4717_v56  ;;  %1058 = vmatpush.msrb.mxu3 %v1057_v24  ;;  %4092 = vtanh.f32 %v591_v39 }
  0xfb   : > { %921 = vmatpush.msrb.mxu0 %v783_v26  ;;  %786 = vmatpush.msra.mxu1 %v785_v2  ;;  %v4089_v26 = vpop.eup %4088  ;;  %4094 = vtanh.f32 %v587_v15 }
  0xfc   : > { %993 = vmatpush.msrb.mxu2 %v4758_v62  ;;  %1064 = vmatpush.msrb.mxu3 %v1063_v3 }
  0xfd   : > { %1096 = vmatpush.msra.mxu0 %v4724_v50  ;;  %788 = vmatmul.f32.vlgmr.msra.gmra.mxu1 %v4705_v19  ;;  %v4862_v50 = vand.u32 4294901760, %v4847_v23 }
  0xfe   : > { %731 = vmatmul.f32.gmra.mxu0 %v4824_v8  ;;  %878 = vmatmul.f32.gmra.mxu3 %v4780_v45 }
  0xff   : > { %952 = vmatpush.msrb.mxu1 %v4650_v6  ;;  %995 = vmatpush.msrb.mxu2 %v4735_v38  ;;  %v4091_v6 = vpop.eup %4090  ;;  %v745_v27 = vsub.f32 %v4847_v23, %v4862_v50 }
 0x100   : > { %1230 = vmatpush.msra.mxu3 %v4712_v5  ;;  %1099 = vmatpush.msra.mxu0 %v4729_v13  ;;  %v627_v13 = vmul.f32 0.5, %v4091_v6 }
 0x101   : > { %1187 = vmatpush.msra.mxu2 %v1043_v59  ;;  %954 = vmatpush.msrb.mxu1 %v4662_v40  ;;  %v631_v40 = vmul.f32 0.5, %v4089_v26  ;;  %v4093_v59 = vpop.eup %4092 }
 0x102   : > { %835 = vmatmul.f32.gmra.mxu2 %v4748_v28  ;;  %1232 = vmatpush.msra.mxu3 %v4717_v56 }
 0x103   : > { %1102 = vmatpush.msra.mxu0 %v4776_v35  ;;  %1191 = vmatpush.msra.mxu2 %v1049_v20  ;;  %v4095_v20 = vpop.eup %4094  ;;  %v647_v35 = vadd.f32 0.5, %v631_v40 }
 0x104   : > { %956 = vmatpush.msrb.mxu1 %v4754_v11  ;;  %1234 = vmatpush.msra.mxu3 %v4758_v62  ;;  %v623_v11 = vmul.f32 0.5, %v4093_v59 }
 0x105   : > { %1105 = vmatpush.msra.mxu0 %v4745_v55  ;;  %1195 = vmatpush.msra.mxu2 %v1055_v48  ;;  %v663_v36 = vmul.f32 %v647_v35, %v4552_v42  ;;  %v600_v48 = vmul.f32 %v4611_v52, %v4554_v43  ;;  %v4899_v42 = vadd.f32 %v4674_v18, %v4670_v53 }
 0x106   : > { %958 = vmatpush.msrb.mxu1 %v4726_v29  ;;  %1236 = vmatpush.msra.mxu3 %v4735_v38  ;;  %v643_v29 = vadd.f32 0.5, %v627_v13  ;;  %v639_v55 = vadd.f32 0.5, %v623_v11 }
 0x107   : > { %1199 = vmatpush.msra.mxu2 %v1061_v25  ;;  %739 = vmatmul.f32.gmra.mxu0 %v4859_v33  ;;  %v4880_v25 = vand.u32 4294901760, %v745_v27  ;;  %4096 = vtanh.f32 %v600_v48  ;;  %v588_v53 = vmul.f32 %v4611_v52, %v4899_v42 }
 0x108   : > { %1140 = vmatpush.msra.mxu1 %v4712_v5  ;;  %884 = vmatmul.f32.gmra.mxu3 %v4830_v41  ;;  %v619_v5 = vmul.f32 0.5, %v4095_v20  ;;  %v659_v14 = vmul.f32 %v643_v29, %v4592_v31  ;;  %v655_v60 = vmul.f32 %v639_v55, %v4806_v54 }
 0x109   : > { %792 = vmatmul.f32.gmra.mxu1 %v4731_v0 }
 0x10a   : > { %1142 = vmatpush.msra.mxu1 %v4717_v56  ;;  %840 = vmatmul.f32.gmra.mxu2 %v4815_v34  ;;  %v635_v17 = vadd.f32 0.5, %v619_v5  ;;  %v4889_v56 = vadd.f32 %v4698_v32, %v4636_v10  ;;  %v4902_v31 = vand.u32 4294901760, %v659_v14  ;;  %v596_v32 = vmul.f32 %v4611_v52, %v4594_v44 }
 0x10b   : > { %v4912_v57 = vand.u32 4294901760, %v655_v60 }
 0x10c   : > { %1144 = vmatpush.msra.mxu1 %v4758_v62  ;;  %v4894_v62 = vand.u32 4294901760, %v663_v36  ;;  %v651_v10 = vmul.f32 %v635_v17, %v4818_v1  ;;  %v4917_v18 = vsub.f32 %v659_v14, %v4902_v31  ;;  %4098 = vtanh.f32 %v596_v32 }
 0x10d   : > { %v4924_v46 = vsub.f32 %v655_v60, %v4912_v57  ;;  %v4097_v51 = vpop.eup %4096 }
 0x10e   : > { %1146 = vmatpush.msra.mxu1 %v4735_v38  ;;  %v592_v38 = vmul.f32 %v4611_v52, %v4889_v56  ;;  %v4910_v37 = vsub.f32 %v663_v36, %v4894_v62  ;;  %v4919_v16 = vand.u32 4294901760, %v651_v10  ;;  %v1327_v7 = vand.u32 4294901760, %v4917_v18 }
 0x10f   : > { %747 = vmatmul.f32.gmra.mxu0 %v4880_v25  ;;  %v1333_v22 = vand.u32 4294901760, %v4924_v46  ;;  %v632_v24 = vmul.f32 0.5, %v4097_v51 }
 0x110   : > { %890 = vmatmul.f32.gmra.mxu3 %v4862_v50  ;;  %4100 = vtanh.f32 %v592_v38  ;;  %v1321_v21 = vand.u32 4294901760, %v4910_v37  ;;  %v4932_v52 = vsub.f32 %v651_v10, %v4919_v16  ;;  %v1328_v2 = vsub.f32 %v4917_v18, %v1327_v7 }
 0x111   : > { %796 = vmatmul.f32.gmra.mxu1 %v4786_v49  ;;  %4102 = vtanh.f32 %v588_v53  ;;  %v1334_v15 = vsub.f32 %v4924_v46, %v1333_v22  ;;  %v648_v63 = vadd.f32 0.5, %v632_v24 }
 0x112   : > { %845 = vmatmul.f32.gmra.mxu2 %v4847_v23  ;;  %v4099_v54 = vpop.eup %4098  ;;  %v1322_v58 = vsub.f32 %v4910_v37, %v1321_v21  ;;  %v1339_v12 = vand.u32 4294901760, %v4932_v52  ;;  %v1329_v6 = vand.u32 4294901760, %v1328_v2 }
 0x113   : > { %v628_v61 = vmul.f32 0.5, %v4099_v54  ;;  %v1335_v20 = vand.u32 4294901760, %v1334_v15  ;;  %v664_v11 = vmul.f32 %v648_v63, %v4554_v43  ;;  %v5061_v15 = vpop.permute.xlu0 %674 }
 0x114   : > { %v1323_v39 = vand.u32 4294901760, %v1322_v58  ;;  %v1340_v40 = vsub.f32 %v4932_v52, %v1339_v12 }
 0x115   : > { %v644_v59 = vadd.f32 0.5, %v628_v61  ;;  %v4966_v55 = vand.u32 4294901760, %v664_v11 }
 0x116   : > { %v4101_v1 = vpop.eup %4100  ;;  %v1341_v35 = vand.u32 4294901760, %v1340_v40 }
 0x117   : > { %923 = vmatmul.f32.vlgmr.msrb.gmra.mxu0 %v4705_v19  ;;  %v4103_v3 = vpop.eup %4102  ;;  %v624_v26 = vmul.f32 0.5, %v4101_v1  ;;  %v660_v29 = vmul.f32 %v644_v59, %v4594_v44  ;;  %v1598_v44 = vsub.f32 %v664_v11, %v4966_v55  ;;  %v5069_v11 = vpop.permute.xlu2 %678 }
 0x118   : > { %1066 = vmatmul.f32.vlgmr.msrb.gmra.mxu3 %v4705_v19  ;;  %1267 = vmatpush.msrb.mxu0 %v4894_v62  ;;  %v620_v13 = vmul.f32 0.5, %v4103_v3 }
 0x119   : > { %800 = vmatmul.f32.gmra.mxu1 %v4832_v9  ;;  %1418 = vmatpush.msrb.mxu3 %v4894_v62  ;;  %v640_v27 = vadd.f32 0.5, %v624_v26  ;;  %v4972_v43 = vand.u32 4294901760, %v660_v29 }
 0x11a   : > { %1001 = vmatmul.f32.vlgmr.msrb.gmra.mxu2 %v4760_v30  ;;  %1269 = vmatpush.msrb.mxu0 %v4902_v31  ;;  %v636_v5 = vadd.f32 0.5, %v620_v13 }
 0x11b   : > { %1374 = vmatpush.msrb.mxu2 %v4910_v37  ;;  %1420 = vmatpush.msrb.mxu3 %v4902_v31  ;;  %v656_v36 = vmul.f32 %v640_v27, %v4889_v56  ;;  %v1604_v48 = vsub.f32 %v660_v29, %v4972_v43  ;;  %v1599_v56 = vand.u32 4294901760, %v1598_v44 }
 0x11c   : > { %1271 = vmatpush.msrb.mxu0 %v4912_v57  ;;  %v652_v14 = vmul.f32 %v636_v5, %v4899_v42 }
 0x11d   : > { %1377 = vmatpush.msrb.mxu2 %v4917_v18  ;;  %1422 = vmatpush.msrb.mxu3 %v4912_v57  ;;  %v4976_v17 = vand.u32 4294901760, %v656_v36  ;;  %v1605_v42 = vand.u32 4294901760, %v1604_v48  ;;  %v1600_v38 = vsub.f32 %v1598_v44, %v1599_v56 }
 0x11e   : > { %1273 = vmatpush.msrb.mxu0 %v4919_v16  ;;  %v4979_v60 = vand.u32 4294901760, %v652_v14 }
 0x11f   : > { %1380 = vmatpush.msrb.mxu2 %v4924_v46  ;;  %1424 = vmatpush.msrb.mxu3 %v4919_v16  ;;  %v1610_v10 = vsub.f32 %v656_v36, %v4976_v17  ;;  %v1606_v51 = vsub.f32 %v1604_v48, %v1605_v42  ;;  %v1601_v58 = vand.u32 4294901760, %v1600_v38  ;;  %v5085_v38 = vpop.permute.xlu2 %1811 }
 0x120   : > { %927 = vmatmul.f32.gmra.mxu0 %v4731_v0  ;;  %1070 = vmatmul.f32.gmra.mxu3 %v4731_v0  ;;  %v1616_v32 = vsub.f32 %v652_v14, %v4979_v60 }
 0x121   : > { %960 = vmatmul.f32.vlgmr.msrb.gmra.mxu1 %v4705_v19  ;;  %1383 = vmatpush.msrb.mxu2 %v4932_v52  ;;  %v1611_v53 = vand.u32 4294901760, %v1610_v10  ;;  %v1607_v1 = vand.u32 4294901760, %v1606_v51 }
 0x122   : > { %1324 = vmatpush.msrb.mxu1 %v1323_v39  ;;  %1009 = vmatmul.f32.gmra.mxu2 %v4824_v8  ;;  %v1617_v54 = vand.u32 4294901760, %v1616_v32 }
 0x123   : > { %v1612_v24 = vsub.f32 %v1610_v10, %v1611_v53 }
 0x124   : > { %1330 = vmatpush.msrb.mxu1 %v1329_v6  ;;  %v1618_v2 = vsub.f32 %v1616_v32, %v1617_v54 }
 0x125   : > { %v1613_v61 = vand.u32 4294901760, %v1612_v24 }
 0x126   : > { %1336 = vmatpush.msrb.mxu1 %v1335_v20  ;;  %v1619_v37 = vand.u32 4294901760, %v1618_v2 }
 0x128   : > { %1342 = vmatpush.msrb.mxu1 %v1341_v35  ;;  %931 = vmatmul.f32.gmra.mxu0 %v4786_v49 }
 0x129   : > { %964 = vmatmul.f32.gmra.mxu1 %v4731_v0  ;;  %1074 = vmatmul.f32.gmra.mxu3 %v4786_v49 }
 0x12a   : > { %1017 = vmatmul.f32.gmra.mxu2 %v4859_v33 }
 0x130   : > { %935 = vmatmul.f32.gmra.mxu0 %v4832_v9 }
 0x131   : > { %968 = vmatmul.f32.gmra.mxu1 %v4786_v49  ;;  %1078 = vmatmul.f32.gmra.mxu3 %v4832_v9 }
 0x132   : > { %1025 = vmatmul.f32.gmra.mxu2 %v4880_v25 }
 0x138   : > { %1108 = vmatmul.f32.vlgmr.msra.gmra.mxu0 %v4710_v4 }
 0x139   : > { %972 = vmatmul.f32.gmra.mxu1 %v4832_v9  ;;  %1238 = vmatmul.f32.vlgmr.msra.gmra.mxu3 %v4705_v19 }
 0x13a   : > { %1465 = vmatpush.msra.mxu0 %v1321_v21  ;;  %1602 = vmatpush.msra.mxu3 %v1601_v58 }
 0x13b   : > { %1201 = vmatmul.f32.vlgmr.msra.gmra.mxu2 %v4705_v19 }
 0x13c   : > { %1469 = vmatpush.msra.mxu0 %v1327_v7  ;;  %1545 = vmatpush.msra.mxu2 %v4966_v55 }
 0x13d   : > { %1608 = vmatpush.msra.mxu3 %v1607_v1 }
 0x13e   : > { %1473 = vmatpush.msra.mxu0 %v1333_v22  ;;  %1547 = vmatpush.msra.mxu2 %v4972_v43  ;;  %v5051_v22 = vpop.permute.xlu1 %682 }
 0x13f   : > { %1614 = vmatpush.msra.mxu3 %v1613_v61 }
 0x140   : > { %1477 = vmatpush.msra.mxu0 %v1339_v12  ;;  %1549 = vmatpush.msra.mxu2 %v4976_v17 }
 0x141   : > { %1620 = vmatpush.msra.mxu3 %v1619_v37  ;;  %1113 = vmatmul.f32.gmra.mxu0 %v4748_v28 }
 0x142   : > { %1150 = vmatmul.f32.vlgmr.msra.gmra.mxu1 %v4721_v47  ;;  %1242 = vmatmul.f32.gmra.mxu3 %v4731_v0 }
 0x143   : > { %1508 = vmatpush.msra.mxu1 %v4894_v62  ;;  %1551 = vmatpush.msra.mxu2 %v4979_v60 }
 0x144   : > { %1205 = vmatmul.f32.gmra.mxu2 %v4731_v0 }
 0x145   : > { %1510 = vmatpush.msra.mxu1 %v4902_v31 }
 0x147   : > { %1512 = vmatpush.msra.mxu1 %v4912_v57 }
 0x149   : > { %1514 = vmatpush.msra.mxu1 %v4919_v16  ;;  %1118 = vmatmul.f32.gmra.mxu0 %v4815_v34 }
 0x14a   : > { %1156 = vmatmul.f32.gmra.mxu1 %v4780_v45  ;;  %1246 = vmatmul.f32.gmra.mxu3 %v4786_v49 }
 0x14c   : > { %1209 = vmatmul.f32.gmra.mxu2 %v4786_v49 }
 0x151   : > { %1123 = vmatmul.f32.gmra.mxu0 %v4847_v23 }
 0x152   : > { %1162 = vmatmul.f32.gmra.mxu1 %v4830_v41  ;;  %1250 = vmatmul.f32.gmra.mxu3 %v4832_v9 }
 0x154   : > { %1213 = vmatmul.f32.gmra.mxu2 %v4832_v9 }
 0x159   : > { %1279 = vmatmul.f32.vlgmr.msrb.gmra.mxu0 %v4760_v30 }
 0x15a   : > { %1168 = vmatmul.f32.gmra.mxu1 %v4862_v50  ;;  %1428 = vmatmul.f32.vlgmr.msrb.gmra.mxu3 %v4721_v47 }
 0x15b   : > { %1652 = vmatpush.msrb.mxu0 %v1598_v44  ;;  %1786 = vmatpush.msrb.mxu3 %v4966_v55 }
 0x15c   : > { %1386 = vmatmul.f32.vlgmr.msrb.gmra.mxu2 %v4710_v4 }
 0x15d   : > { %1655 = vmatpush.msrb.mxu0 %v1604_v48  ;;  %1743 = vmatpush.msrb.mxu2 %v1599_v56 }
 0x15e   : > { %1788 = vmatpush.msrb.mxu3 %v4972_v43 }
 0x15f   : > { %1658 = vmatpush.msrb.mxu0 %v1610_v10  ;;  %1747 = vmatpush.msrb.mxu2 %v1605_v42 }
 0x160   : > { %1790 = vmatpush.msrb.mxu3 %v4976_v17 }
 0x161   : > { %1661 = vmatpush.msrb.mxu0 %v1616_v32  ;;  %1751 = vmatpush.msrb.mxu2 %v1611_v53 }
 0x162   : > { %1792 = vmatpush.msrb.mxu3 %v4979_v60  ;;  %1287 = vmatmul.f32.gmra.mxu0 %v4824_v8 }
 0x163   : > { %1344 = vmatmul.f32.vlgmr.msrb.gmra.mxu1 %v4705_v19  ;;  %1755 = vmatpush.msrb.mxu2 %v1617_v54 }
 0x164   : > { %1696 = vmatpush.msrb.mxu1 %v4966_v55  ;;  %1391 = vmatmul.f32.gmra.mxu2 %v4748_v28 }
 0x165   : > { %1434 = vmatmul.f32.gmra.mxu3 %v4780_v45 }
 0x166   : > { %1698 = vmatpush.msrb.mxu1 %v4972_v43 }
 0x168   : > { %1700 = vmatpush.msrb.mxu1 %v4976_v17 }
 0x16a   : > { %1702 = vmatpush.msrb.mxu1 %v4979_v60  ;;  %1295 = vmatmul.f32.gmra.mxu0 %v4859_v33 }
 0x16b   : > { %1348 = vmatmul.f32.gmra.mxu1 %v4731_v0 }
 0x16c   : > { %1396 = vmatmul.f32.gmra.mxu2 %v4815_v34 }
 0x16d   : > { %1440 = vmatmul.f32.gmra.mxu3 %v4830_v41 }
 0x171   : > { %v724_v62 = vpop.f32.mrf.mxu0 }
 0x172   : > { %1303 = vmatmul.f32.gmra.mxu0 %v4880_v25 }
 0x173   : > { %1352 = vmatmul.f32.gmra.mxu1 %v4786_v49 }
 0x174   : > { %1401 = vmatmul.f32.gmra.mxu2 %v4847_v23 }
 0x175   : > { %1446 = vmatmul.f32.gmra.mxu3 %v4862_v50 }
 0x178   : > { %v873_v31 = vpop.f32.mrf.mxu3 }
 0x17a   : > { %1479 = vmatmul.f32.vlgmr.msra.gmra.mxu0 %v4705_v19  ;;  %v789_v18 = vpop.f32.mrf.mxu1  ;;  %v831_v16 = vpop.f32.mrf.mxu2 }
 0x17b   : > { %1356 = vmatmul.f32.gmra.mxu1 %v4832_v9  ;;  %v732_v57 = vpop.f32.mrf.mxu0 }
 0x17c   : > { %1557 = vmatmul.f32.vlgmr.msra.gmra.mxu2 %v4760_v30  ;;  %v733_v40 = vadd.f32 %v732_v57, %v5061_v15 }
 0x17d   : > { %1622 = vmatmul.f32.vlgmr.msra.gmra.mxu3 %v4705_v19 }
 0x181   : > { %v879_v46 = vpop.f32.mrf.mxu3 }
 0x182   : > { %1483 = vmatmul.f32.gmra.mxu0 %v4731_v0 }
 0x183   : > { %1516 = vmatmul.f32.vlgmr.msra.gmra.mxu1 %v4705_v19 }
 0x184   : > { %1565 = vmatmul.f32.gmra.mxu2 %v4824_v8  ;;  %v740_v21 = vpop.f32.mrf.mxu0  ;;  %v5058_v8 = vpop.permute.xlu1 %670 }
 0x185   : > { %1626 = vmatmul.f32.gmra.mxu3 %v4731_v0  ;;  %v836_v7 = vpop.f32.mrf.mxu2  ;;  %v725_v59 = vadd.f32 %v724_v62, %v5058_v8  ;;  %v741_v55 = vadd.f32 %v740_v21, %v5069_v11 }
 0x186   : > { %v793_v52 = vpop.f32.mrf.mxu1 }
 0x187   : > { %v794_v13 = vadd.f32 %v793_v52, %v733_v40  ;;  %v790_v20 = vadd.f32 %v789_v18, %v725_v59 }
 0x189   : > { %v837_v5 = vadd.f32 %v836_v7, %v794_v13 }
 0x18a   : > { %1487 = vmatmul.f32.gmra.mxu0 %v4786_v49 }
 0x18b   : > { %1520 = vmatmul.f32.gmra.mxu1 %v4731_v0  ;;  %v885_v30 = vpop.f32.mrf.mxu3  ;;  %v880_v36 = vadd.f32 %v879_v46, %v837_v5 }
 0x18c   : > { %1573 = vmatmul.f32.gmra.mxu2 %v4859_v33  ;;  %v748_v12 = vpop.f32.mrf.mxu0 }
 0x18d   : > { %1630 = vmatmul.f32.gmra.mxu3 %v4786_v49  ;;  %v841_v39 = vpop.f32.mrf.mxu2  ;;  %v749_v10 = vadd.f32 %v748_v12, %v5051_v22 }
 0x18e   : > { %v797_v3 = vpop.f32.mrf.mxu1 }
 0x18f   : > { %v798_v43 = vadd.f32 %v797_v3, %v741_v55 }
 0x191   : > { %v842_v42 = vadd.f32 %v841_v39, %v798_v43 }
 0x192   : > { %1491 = vmatmul.f32.gmra.mxu0 %v4832_v9 }
 0x193   : > { %1524 = vmatmul.f32.gmra.mxu1 %v4786_v49  ;;  %v891_v63 = vpop.f32.mrf.mxu3  ;;  %v886_v53 = vadd.f32 %v885_v30, %v842_v42 }
 0x194   : > { %1581 = vmatmul.f32.gmra.mxu2 %v4880_v25  ;;  %v924_v26 = vpop.f32.mrf.mxu0 }
 0x195   : > { %1634 = vmatmul.f32.gmra.mxu3 %v4832_v9  ;;  %v846_v6 = vpop.f32.mrf.mxu2 }
 0x196   : > { %v801_v33 = vpop.f32.mrf.mxu1 }
 0x197   : > { %v802_v51 = vadd.f32 %v801_v33, %v749_v10 }
 0x199   : > { %v847_v61 = vadd.f32 %v846_v6, %v802_v51 }
 0x19a   : > { %1664 = vmatmul.f32.vlgmr.msrb.gmra.mxu0 %v4710_v4  ;;  %v832_v4 = vadd.f32 %v831_v16, %v790_v20 }
 0x19b   : > { %1528 = vmatmul.f32.gmra.mxu1 %v4832_v9  ;;  %v5072_v25 = vpop.f32.mrf.mxu3 }
 0x19c   : > { %1757 = vmatmul.f32.vlgmr.msrb.gmra.mxu2 %v4705_v19  ;;  %v874_v14 = vadd.f32 %v873_v31, %v832_v4 }
 0x19d   : > { %v928_v27 = vpop.f32.mrf.mxu0  ;;  %1794 = vmatmul.f32.vlgmr.msrb.gmra.mxu3 %v4705_v19  ;;  %v5075_v29 = vpop.f32.mrf.mxu2 }
 0x19e   : > { %v961_v35 = vpop.f32.mrf.mxu1  ;;  %v929_v17 = vadd.f32 %v928_v27, %v880_v36  ;;  %v925_v48 = vadd.f32 %v924_v26, %v874_v14 }
 0x1a0   : > { %v962_v32 = vadd.f32 %v961_v35, %v925_v48 }
 0x1a2   : > { %1669 = vmatmul.f32.gmra.mxu0 %v4748_v28  ;;  %v1814_v54 = vmul.f32 %v5085_v38, %v962_v32 }
 0x1a3   : > { %1706 = vmatmul.f32.vlgmr.msrb.gmra.mxu1 %v4721_v47  ;;  %v5081_v44 = vpop.f32.mrf.mxu3 }
 0x1a4   : > { %1761 = vmatmul.f32.gmra.mxu2 %v4731_v0 }
 0x1a5   : > { %v932_v19 = vpop.f32.mrf.mxu0  ;;  %1798 = vmatmul.f32.gmra.mxu3 %v4731_v0  ;;  %v1010_v56 = vpop.f32.mrf.mxu2 }
 0x1a6   : > { %v965_v60 = vpop.f32.mrf.mxu1  ;;  %v933_v58 = vadd.f32 %v932_v19, %v886_v53  ;;  %v1011_v13 = vadd.f32 %v1010_v56, %v5061_v15  ;;  %v3988_v19 = vld [vmem:[%s5716_s4 + $0x20] sm:$0xff] }
 0x1a7   : > { %v966_v28 = vadd.f32 %v965_v60, %v929_v17  ;;  %v1916_v10 = vsel %vm685_vm0, %v3988_v19, 0 }
 0x1a9   : > { %v1818_v47 = vmul.f32 %v5085_v38, %v966_v28 }
 0x1aa   : > { %1674 = vmatmul.f32.gmra.mxu0 %v4815_v34 }
 0x1ab   : > { %1712 = vmatmul.f32.gmra.mxu1 %v4780_v45  ;;  %4104 = vtanh.f32 %v1818_v47  ;;  %v892_v45 = vadd.f32 %v891_v63, %v847_v61 }
 0x1ac   : > { %1765 = vmatmul.f32.gmra.mxu2 %v4786_v49  ;;  %v5091_v0 = vpop.f32.mrf.mxu3  ;;  %4106 = vtanh.f32 %v1814_v54 }
 0x1ad   : > { %v936_v24 = vpop.f32.mrf.mxu0  ;;  %1802 = vmatmul.f32.gmra.mxu3 %v4786_v49  ;;  %v1018_v2 = vpop.f32.mrf.mxu2 }
 0x1ae   : > { %v969_v1 = vpop.f32.mrf.mxu1  ;;  %v937_v49 = vadd.f32 %v936_v24, %v892_v45  ;;  %v1019_v47 = vadd.f32 %v1018_v2, %v5069_v11 }
 0x1af   : > { %v970_v37 = vadd.f32 %v969_v1, %v933_v58 }
 0x1b0   : > { %v1076_v45 = vadd.f32 %v5091_v0, %v1019_v47  ;;  %v3989_v0 = vld [vmem:[%s5716_s4 + $0x28] sm:$0xff] }
 0x1b1   : > { %v1822_v34 = vmul.f32 %v5085_v38, %v970_v37  ;;  %v4105_v62 = vpop.eup %4104 }
 0x1b2   : > { %1679 = vmatmul.f32.gmra.mxu0 %v4847_v23  ;;  %v4107_v18 = vpop.eup %4106  ;;  %v1850_v21 = vmul.f32 0.5, %v4105_v62 }
 0x1b3   : > { %4108 = vtanh.f32 %v1822_v34  ;;  %1718 = vmatmul.f32.gmra.mxu1 %v4830_v41  ;;  %v1846_v30 = vmul.f32 0.5, %v4107_v18 }
 0x1b4   : > { %1769 = vmatmul.f32.gmra.mxu2 %v4832_v9  ;;  %v5099_v31 = vpop.f32.mrf.mxu3  ;;  %v1866_v12 = vadd.f32 0.5, %v1850_v21 }
 0x1b5   : > { %v1109_v57 = vpop.f32.mrf.mxu0  ;;  %1806 = vmatmul.f32.gmra.mxu3 %v4832_v9  ;;  %v5102_v46 = vpop.f32.mrf.mxu2  ;;  %v1003_v9 = vadd.f32 %v5075_v29, %v5058_v8  ;;  %v1862_v63 = vadd.f32 0.5, %v1846_v30  ;;  %v1072_v29 = vadd.f32 %v5081_v44, %v1011_v13 }
 0x1b6   : > { %v973_v16 = vpop.f32.mrf.mxu1  ;;  %v1882_v40 = vmul.f32 %v1866_v12, %v966_v28  ;;  %v1027_v12 = vadd.f32 %v5102_v46, %v5051_v22  ;;  %v3991_v46 = vld [vmem:[%s5716_s4 + $0x38] sm:$0xff] }
 0x1b7   : > { %v974_v52 = vadd.f32 %v973_v16, %v937_v49  ;;  %v1068_v27 = vadd.f32 %v5072_v25, %v1003_v9  ;;  %v1878_v35 = vmul.f32 %v1862_v63, %v962_v32  ;;  %v5127_v32 = vand.u32 4294901760, %v1916_v10 }
 0x1b8   : > { %v5112_v55 = vand.u32 4294901760, %v1882_v40  ;;  %v1080_v19 = vadd.f32 %v5099_v31, %v1027_v12 }
 0x1b9   : > { %v4109_v23 = vpop.eup %4108  ;;  %v1826_v7 = vmul.f32 %v5085_v38, %v974_v52  ;;  %v1110_v4 = vadd.f32 %v1109_v57, %v1068_v27  ;;  %v5115_v17 = vand.u32 4294901760, %v1878_v35  ;;  %v5133_v58 = vsub.f32 %v1916_v10, %v5127_v32 }
 0x1ba   : > { %v1854_v41 = vmul.f32 0.5, %v4109_v23  ;;  %v5125_v44 = vsub.f32 %v1882_v40, %v5112_v55 }
 0x1bb   : > { %4110 = vtanh.f32 %v1826_v7  ;;  %1724 = vmatmul.f32.gmra.mxu1 %v4862_v50  ;;  %v5136_v24 = vsub.f32 %v1878_v35, %v5115_v17  ;;  %v5143_v2 = vand.u32 4294901760, %v5133_v58 }
 0x1bc   : > { %v1870_v3 = vadd.f32 0.5, %v1854_v41  ;;  %v1239_v39 = vpop.f32.mrf.mxu3  ;;  %v2006_v34 = vand.u32 4294901760, %v5125_v44  ;;  %v1919_v41 = vsel %vm685_vm0, %v3989_v0, 0 }
 0x1bd   : > { %v1950_v16 = vsub.f32 %v5133_v58, %v5143_v2  ;;  %v2012_v21 = vand.u32 4294901760, %v5136_v24 }
 0x1be   : > { %v1886_v33 = vmul.f32 %v1870_v3, %v970_v37  ;;  %v1114_v26 = vpop.f32.mrf.mxu0  ;;  %v1202_v6 = vpop.f32.mrf.mxu2  ;;  %v2007_v63 = vsub.f32 %v5125_v44, %v2006_v34 }
 0x1bf   : > { %v1151_v59 = vpop.f32.mrf.mxu1  ;;  %v1115_v25 = vadd.f32 %v1114_v26, %v1072_v29  ;;  %v5166_v9 = vand.u32 4294901760, %v1950_v16  ;;  %v3990_v26 = vld [vmem:[%s5716_s4 + $0x30] sm:$0xff] }
 0x1c0   : > { %v5110_v5 = vand.u32 4294901760, %v1886_v33  ;;  %v1152_v43 = vadd.f32 %v1151_v59, %v1110_v4  ;;  %v1922_v13 = vsel %vm685_vm0, %v3990_v26, 0 }
 0x1c1   : > { %v4111_v20 = vpop.eup %4110  ;;  %v5190_v35 = vand.u32 4294901760, %v1922_v13 }
 0x1c2   : > { %v1858_v50 = vmul.f32 0.5, %v4111_v20  ;;  %v5121_v56 = vsub.f32 %v1886_v33, %v5110_v5  ;;  %v1203_v54 = vadd.f32 %v1202_v6, %v1152_v43  ;;  %v5171_v33 = vand.u32 4294901760, %v1919_v41 }
 0x1c3   : > { %v2013_v20 = vsub.f32 %v5136_v24, %v2012_v21 }
 0x1c4   : > { %v1874_v36 = vadd.f32 0.5, %v1858_v50  ;;  %v2000_v37 = vand.u32 4294901760, %v5121_v56  ;;  %v5150_v57 = vadd.f32 %v1239_v39, %v1203_v54  ;;  %v5188_v27 = vsub.f32 %v1919_v41, %v5171_v33 }
 0x1c5   : > { %v1243_v14 = vpop.f32.mrf.mxu3 }
 0x1c6   : > { %v1890_v48 = vmul.f32 %v1874_v36, %v974_v52  ;;  %v1119_v60 = vpop.f32.mrf.mxu0  ;;  %v2001_v30 = vsub.f32 %v5121_v56, %v2000_v37  ;;  %v1815_v50 = vmul.f32 %v5085_v38, %v5150_v57  ;;  %v1925_v36 = vsel %vm685_vm0, %v3991_v46, 0 }
 0x1c7   : > { %v1157_v42 = vpop.f32.mrf.mxu1  ;;  %v1206_v28 = vpop.f32.mrf.mxu2  ;;  %v1120_v52 = vadd.f32 %v1119_v60, %v1076_v45  ;;  %v5197_v43 = vand.u32 4294901760, %v5188_v27 }
 0x1c8   : > { %v5130_v53 = vand.u32 4294901760, %v1890_v48  ;;  %v1158_v51 = vadd.f32 %v1157_v42, %v1115_v25  ;;  %v2002_v29 = vand.u32 4294901760, %v2001_v30  ;;  %v2008_v25 = vand.u32 4294901760, %v2007_v63 }
 0x1c9   : > { %v5210_v42 = vand.u32 4294901760, %v1925_v36 }
 0x1ca   : > { %v1993_v1 = vsub.f32 %v1890_v48, %v5130_v53  ;;  %v1207_v61 = vadd.f32 %v1206_v28, %v1158_v51  ;;  %1940 = vmatpush.msra.mxu0 %v5130_v53  ;;  %2091 = vmatpush.msra.mxu3 %v5130_v53  ;;  %v2014_v51 = vand.u32 4294901760, %v2013_v20 }
 0x1cc   : > { %v5147_v62 = vadd.f32 %v1243_v14, %v1207_v61  ;;  %1942 = vmatpush.msra.mxu0 %v5110_v5  ;;  %2047 = vmatpush.msra.mxu2 %v1993_v1  ;;  %v1994_v49 = vand.u32 4294901760, %v1993_v1  ;;  %v5201_v14 = vsub.f32 %v1922_v13, %v5190_v35 }
 0x1cd   : > { %2093 = vmatpush.msra.mxu3 %v5110_v5  ;;  %v1247_v18 = vpop.f32.mrf.mxu3 }
 0x1ce   : > { %v1124_v23 = vpop.f32.mrf.mxu0  ;;  %1944 = vmatpush.msra.mxu0 %v5112_v55  ;;  %2050 = vmatpush.msra.mxu2 %v5121_v56  ;;  %v1995_v7 = vsub.f32 %v1993_v1, %v1994_v49  ;;  %v1819_v6 = vmul.f32 %v5085_v38, %v5147_v62  ;;  %v1958_v56 = vsub.f32 %v5188_v27, %v5197_v43  ;;  %v5208_v10 = vand.u32 4294901760, %v5201_v14 }
 0x1cf   : > { %v1163_v3 = vpop.f32.mrf.mxu1  ;;  %v1210_v39 = vpop.f32.mrf.mxu2  ;;  %2095 = vmatpush.msra.mxu3 %v5112_v55  ;;  %v1125_v28 = vadd.f32 %v1124_v23, %v1080_v19 }
 0x1d0   : > { %v1164_v40 = vadd.f32 %v1163_v3, %v1120_v52  ;;  %1946 = vmatpush.msra.mxu0 %v5115_v17  ;;  %2053 = vmatpush.msra.mxu2 %v5125_v44  ;;  %v1996_v59 = vand.u32 4294901760, %v1995_v7  ;;  %4112 = vtanh.f32 %v1819_v6  ;;  %v5217_v1 = vand.u32 4294901760, %v1958_v56 }
 0x1d1   : > { %2097 = vmatpush.msra.mxu3 %v5115_v17  ;;  %1952 = vmatmul.f32.vlgmr.msra.gmra.mxu0 %v5166_v9  ;;  %4114 = vtanh.f32 %v1815_v50  ;;  %v1966_v44 = vsub.f32 %v5201_v14, %v5208_v10 }
 0x1d2   : > { %v1211_v4 = vadd.f32 %v1210_v39, %v1164_v40  ;;  %2138 = vmatpush.msrb.mxu0 %v1994_v49  ;;  %1997 = vmatpush.msra.mxu1 %v1996_v59 }
 0x1d3   : > { %2056 = vmatpush.msra.mxu2 %v5136_v24  ;;  %2101 = vmatmul.f32.vlgmr.msra.gmra.mxu3 %v5143_v2 }
 0x1d4   : > { %v1248_v48 = vadd.f32 %v1247_v18, %v1211_v4  ;;  %2142 = vmatpush.msrb.mxu0 %v2000_v37  ;;  %2003 = vmatpush.msra.mxu1 %v2002_v29  ;;  %v5224_v37 = vsub.f32 %v1925_v36, %v5210_v42 }
 0x1d5   : > { %2059 = vmatmul.f32.vlgmr.msra.gmra.mxu2 %v5133_v58  ;;  %v1251_v60 = vpop.f32.mrf.mxu3 }
 0x1d6   : > { %v1823_v31 = vmul.f32 %v5085_v38, %v1248_v48  ;;  %2146 = vmatpush.msrb.mxu0 %v2006_v34  ;;  %v5215_v47 = vpop.f32.mrf.mxu0  ;;  %2009 = vmatpush.msra.mxu1 %v2008_v25  ;;  %v4113_v34 = vpop.eup %4112  ;;  %v5233_v0 = vand.u32 4294901760, %v5224_v37 }
 0x1d7   : > { %v1169_v54 = vpop.f32.mrf.mxu1  ;;  %v1214_v24 = vpop.f32.mrf.mxu2  ;;  %v1851_v16 = vmul.f32 0.5, %v4113_v34 }
 0x1d8   : > { %4116 = vtanh.f32 %v1823_v31  ;;  %v1170_v61 = vadd.f32 %v1169_v54, %v1125_v28  ;;  %2150 = vmatpush.msrb.mxu0 %v2012_v21  ;;  %2015 = vmatpush.msra.mxu1 %v2014_v51  ;;  %v4115_v49 = vpop.eup %4114  ;;  %v5230_v21 = vand.u32 4294901760, %v1966_v44 }
 0x1d9   : > { %1960 = vmatmul.f32.gmra.mxu0 %v5217_v1  ;;  %2017 = vmatmul.f32.vlgmr.msra.gmra.mxu1 %v5127_v32  ;;  %v1847_v7 = vmul.f32 0.5, %v4115_v49  ;;  %v1867_v3 = vadd.f32 0.5, %v1851_v16 }
 0x1da   : > { %v1215_v45 = vadd.f32 %v1214_v24, %v1170_v61  ;;  %2181 = vmatpush.msrb.mxu1 %v5130_v53 }
 0x1db   : > { %2107 = vmatmul.f32.gmra.mxu3 %v5197_v43  ;;  %v1863_v63 = vadd.f32 0.5, %v1847_v7  ;;  %v1883_v46 = vmul.f32 %v1867_v3, %v5147_v62 }
 0x1dc   : > { %v1252_v18 = vadd.f32 %v1251_v60, %v1215_v45  ;;  %2183 = vmatpush.msrb.mxu1 %v5110_v5 }
 0x1dd   : > { %2064 = vmatmul.f32.gmra.mxu2 %v5188_v27  ;;  %v5237_v53 = vpop.f32.mrf.mxu3  ;;  %v1879_v40 = vmul.f32 %v1863_v63, %v5150_v57  ;;  %v5264_v36 = vand.u32 4294901760, %v1883_v46 }
 0x1de   : > { %v4117_v52 = vpop.eup %4116  ;;  %v1827_v23 = vmul.f32 %v5085_v38, %v1252_v18  ;;  %2185 = vmatpush.msrb.mxu1 %v5112_v55  ;;  %v1974_v55 = vsub.f32 %v5224_v37, %v5233_v0 }
 0x1df   : > { %v1855_v30 = vmul.f32 0.5, %v4117_v52  ;;  %v5239_v41 = vpop.f32.mrf.mxu0  ;;  %v5241_v5 = vpop.f32.mrf.mxu2  ;;  %v5268_v19 = vand.u32 4294901760, %v1879_v40  ;;  %v2283_v60 = vsub.f32 %v1883_v46, %v5264_v36 }
 0x1e0   : > { %4118 = vtanh.f32 %v1827_v23  ;;  %v5243_v12 = vpop.f32.mrf.mxu1  ;;  %2187 = vmatpush.msrb.mxu1 %v5115_v17  ;;  %v5253_v6 = vand.u32 4294901760, %v1974_v55  ;;  %v1289_v46 = vadd.f32 %v5239_v41, %v5061_v15 }
 0x1e1   : > { %v1871_v39 = vadd.f32 0.5, %v1855_v30  ;;  %1968 = vmatmul.f32.gmra.mxu0 %v5230_v21  ;;  %2021 = vmatmul.f32.gmra.mxu1 %v5171_v33  ;;  %v2289_v51 = vsub.f32 %v1879_v40, %v5268_v19  ;;  %v2284_v34 = vand.u32 4294901760, %v2283_v60 }
 0x1e3   : > { %v1887_v26 = vmul.f32 %v1871_v39, %v1248_v48  ;;  %2113 = vmatmul.f32.gmra.mxu3 %v5208_v10  ;;  %v2285_v52 = vsub.f32 %v2283_v60, %v2284_v34 }
 0x1e5   : > { %2069 = vmatmul.f32.gmra.mxu2 %v5201_v14  ;;  %v5256_v59 = vand.u32 4294901760, %v1887_v26  ;;  %v2286_v63 = vand.u32 4294901760, %v2285_v52 }
 0x1e6   : > { %v4119_v17 = vpop.eup %4118 }
 0x1e7   : > { %v1859_v13 = vmul.f32 0.5, %v4119_v17  ;;  %v5258_v20 = vpop.f32.mrf.mxu0  ;;  %v5260_v50 = vpop.f32.mrf.mxu2  ;;  %v2277_v48 = vsub.f32 %v1887_v26, %v5256_v59  ;;  %v1281_v17 = vadd.f32 %v5215_v47, %v5058_v8 }
 0x1e8   : > { %v1349_v4 = vpop.f32.mrf.mxu1  ;;  %v5262_v29 = vpop.f32.mrf.mxu3  ;;  %v1297_v47 = vadd.f32 %v5258_v20, %v5069_v11 }
 0x1e9   : > { %v1875_v62 = vadd.f32 0.5, %v1859_v13  ;;  %1976 = vmatmul.f32.gmra.mxu0 %v5253_v6  ;;  %2025 = vmatmul.f32.gmra.mxu1 %v5190_v35  ;;  %v2278_v54 = vand.u32 4294901760, %v2277_v48  ;;  %v1350_v40 = vadd.f32 %v1349_v4, %v1289_v46 }
 0x1eb   : > { %v1891_v57 = vmul.f32 %v1875_v62, %v1252_v18  ;;  %2119 = vmatmul.f32.gmra.mxu3 %v5233_v0  ;;  %v2279_v49 = vsub.f32 %v2277_v48, %v2278_v54  ;;  %v2290_v18 = vand.u32 4294901760, %v2289_v51  ;;  %v1393_v41 = vadd.f32 %v5260_v50, %v1350_v40 }
 0x1ed   : > { %v2217_v25 = vand.u32 4294901760, %v1891_v57  ;;  %2074 = vmatmul.f32.gmra.mxu2 %v5224_v37  ;;  %v2280_v30 = vand.u32 4294901760, %v2279_v49  ;;  %v2291_v3 = vsub.f32 %v2289_v51, %v2290_v18 }
 0x1ef   : > { %v2271_v56 = vsub.f32 %v1891_v57, %v2217_v25  ;;  %v5274_v28 = vpop.f32.mrf.mxu0  ;;  %v5276_v31 = vpop.f32.mrf.mxu2  ;;  %2218 = vmatpush.msrb.mxu2 %v2217_v25  ;;  %2369 = vmatpush.msra.mxu1 %v2217_v25  ;;  %v2292_v26 = vand.u32 4294901760, %v2291_v3  ;;  %v1346_v57 = vadd.f32 %v5243_v12, %v1281_v17  ;;  %v1436_v12 = vadd.f32 %v5262_v29, %v1393_v41 }
 0x1f0   : > { %v1353_v24 = vpop.f32.mrf.mxu1  ;;  %v5279_v61 = vpop.f32.mrf.mxu3  ;;  %v1305_v29 = vadd.f32 %v5274_v28, %v5051_v22 }
 0x1f1   : > { %2220 = vmatpush.msrb.mxu2 %v5256_v59  ;;  %2325 = vmatpush.msra.mxu0 %v2271_v56  ;;  %v2272_v44 = vand.u32 4294901760, %v2271_v56  ;;  %v1388_v4 = vadd.f32 %v5241_v5, %v1346_v57 }
 0x1f2   : > { %2371 = vmatpush.msra.mxu1 %v5256_v59  ;;  %2152 = vmatmul.f32.vlgmr.msrb.gmra.mxu0 %v5127_v32 }
 0x1f3   : > { %2029 = vmatmul.f32.gmra.mxu1 %v5210_v42  ;;  %2222 = vmatpush.msrb.mxu2 %v5264_v36  ;;  %v2273_v45 = vsub.f32 %v2271_v56, %v2272_v44  ;;  %v1430_v56 = vadd.f32 %v5237_v53, %v1388_v4 }
 0x1f4   : > { %2328 = vmatpush.msra.mxu0 %v2277_v48  ;;  %2373 = vmatpush.msra.mxu1 %v5264_v36 }
 0x1f5   : > { %2224 = vmatpush.msrb.mxu2 %v5268_v19  ;;  %v2274_v16 = vand.u32 4294901760, %v2273_v45 }
 0x1f6   : > { %2331 = vmatpush.msra.mxu0 %v2283_v60  ;;  %2375 = vmatpush.msra.mxu1 %v5268_v19 }
 0x1f7   : > { %2230 = vmatmul.f32.vlgmr.msrb.gmra.mxu2 %v5166_v9  ;;  %v5290_v23 = vpop.f32.mrf.mxu2  ;;  %v1480_v7 = vpop.f32.mrf.mxu0  ;;  %2275 = vmatpush.msrb.mxu3 %v2274_v16 }
 0x1f8   : > { %2416 = vmatpush.msra.mxu2 %v2272_v44  ;;  %v1357_v39 = vpop.f32.mrf.mxu1  ;;  %2334 = vmatpush.msra.mxu0 %v2289_v51  ;;  %v5292_v55 = vpop.f32.mrf.mxu3  ;;  %v1481_v5 = vadd.f32 %v1480_v7, %v1430_v56 }
 0x1f9   : > { %2281 = vmatpush.msrb.mxu3 %v2280_v30 }
 0x1fa   : > { %2420 = vmatpush.msra.mxu2 %v2278_v54  ;;  %2156 = vmatmul.f32.gmra.mxu0 %v5171_v33 }
 0x1fb   : > { %2189 = vmatmul.f32.vlgmr.msrb.gmra.mxu1 %v5127_v32  ;;  %2287 = vmatpush.msrb.mxu3 %v2286_v63 }
 0x1fc   : > { %2424 = vmatpush.msra.mxu2 %v2284_v34  ;;  %v1358_v34 = vadd.f32 %v1357_v39, %v1305_v29 }
 0x1fd   : > { %2293 = vmatpush.msrb.mxu3 %v2292_v26 }
 0x1fe   : > { %2428 = vmatpush.msra.mxu2 %v2290_v18  ;;  %2295 = vmatmul.f32.vlgmr.msrb.gmra.mxu3 %v5127_v32  ;;  %v1403_v52 = vadd.f32 %v5290_v23, %v1358_v34 }
 0x1ff   : > { %2238 = vmatmul.f32.gmra.mxu2 %v5217_v1  ;;  %2459 = vmatpush.msra.mxu3 %v2217_v25  ;;  %v1484_v13 = vpop.f32.mrf.mxu0  ;;  %v5302_v62 = vpop.f32.mrf.mxu2  ;;  %v1354_v25 = vadd.f32 %v1353_v24, %v1297_v47 }
 0x200   : > { %v1517_v48 = vpop.f32.mrf.mxu1  ;;  %v5305_v60 = vpop.f32.mrf.mxu3  ;;  %v1485_v20 = vadd.f32 %v1484_v13, %v1436_v12  ;;  %v1448_v30 = vadd.f32 %v5292_v55, %v1403_v52 }
 0x201   : > { %2461 = vmatpush.msra.mxu3 %v5256_v59 }
 0x202   : > { %2160 = vmatmul.f32.gmra.mxu0 %v5190_v35 }
 0x203   : > { %2193 = vmatmul.f32.gmra.mxu1 %v5171_v33  ;;  %2463 = vmatpush.msra.mxu3 %v5264_v36  ;;  %v1398_v36 = vadd.f32 %v5276_v31, %v1354_v25 }
 0x205   : > { %2465 = vmatpush.msra.mxu3 %v5268_v19  ;;  %v1518_v19 = vadd.f32 %v1517_v48, %v1481_v5  ;;  %v1442_v44 = vadd.f32 %v5279_v61, %v1398_v36 }
 0x206   : > { %2299 = vmatmul.f32.gmra.mxu3 %v5171_v33 }
 0x207   : > { %2246 = vmatmul.f32.gmra.mxu2 %v5230_v21  ;;  %v1488_v59 = vpop.f32.mrf.mxu0  ;;  %v1566_v50 = vpop.f32.mrf.mxu2  ;;  %v1816_v18 = vmul.f32 %v5085_v38, %v1518_v19 }
 0x208   : > { %v1521_v51 = vpop.f32.mrf.mxu1  ;;  %v5320_v54 = vpop.f32.mrf.mxu3  ;;  %v1489_v45 = vadd.f32 %v1488_v59, %v1442_v44  ;;  %v1559_v59 = vadd.f32 %v5302_v62, %v5058_v8  ;;  %v1567_v36 = vadd.f32 %v1566_v50, %v5061_v15 }
 0x209   : > { %v1522_v24 = vadd.f32 %v1521_v51, %v1485_v20 }
 0x20a   : > { %2164 = vmatmul.f32.gmra.mxu0 %v5210_v42  ;;  %v1624_v34 = vadd.f32 %v5305_v60, %v1559_v59 }
 0x20b   : > { %2197 = vmatmul.f32.gmra.mxu1 %v5190_v35  ;;  %v1820_v53 = vmul.f32 %v5085_v38, %v1522_v24 }
 0x20d   : > { %4120 = vtanh.f32 %v1820_v53 }
 0x20e   : > { %2303 = vmatmul.f32.gmra.mxu3 %v5190_v35  ;;  %4122 = vtanh.f32 %v1816_v18 }
 0x20f   : > { %2254 = vmatmul.f32.gmra.mxu2 %v5253_v6  ;;  %v1492_v31 = vpop.f32.mrf.mxu0  ;;  %v5331_v49 = vpop.f32.mrf.mxu2 }
 0x210   : > { %v1525_v16 = vpop.f32.mrf.mxu1  ;;  %v5334_v28 = vpop.f32.mrf.mxu3  ;;  %v1493_v3 = vadd.f32 %v1492_v31, %v1448_v30  ;;  %v1628_v31 = vadd.f32 %v5320_v54, %v1567_v36  ;;  %v1575_v54 = vadd.f32 %v5331_v49, %v5069_v11 }
 0x211   : > { %v1526_v7 = vadd.f32 %v1525_v16, %v1489_v45 }
 0x212   : > { %2337 = vmatmul.f32.vlgmr.msra.gmra.mxu0 %v5133_v58  ;;  %v1632_v11 = vadd.f32 %v5334_v28, %v1575_v54 }
 0x213   : > { %v1824_v61 = vmul.f32 %v5085_v38, %v1526_v7  ;;  %2201 = vmatmul.f32.gmra.mxu1 %v5210_v42  ;;  %v4121_v63 = vpop.eup %4120 }
 0x214   : > { %v4123_v40 = vpop.eup %4122  ;;  %v1852_v57 = vmul.f32 0.5, %v4121_v63 }
 0x215   : > { %4124 = vtanh.f32 %v1824_v61  ;;  %v1848_v41 = vmul.f32 0.5, %v4123_v40 }
 0x216   : > { %2307 = vmatmul.f32.gmra.mxu3 %v5210_v42  ;;  %v1868_v4 = vadd.f32 0.5, %v1852_v57 }
 0x217   : > { %2430 = vmatmul.f32.vlgmr.msra.gmra.mxu2 %v5127_v32  ;;  %v5343_v39 = vpop.f32.mrf.mxu2  ;;  %v1665_v23 = vpop.f32.mrf.mxu0  ;;  %v1864_v51 = vadd.f32 0.5, %v1848_v41 }
 0x218   : > { %v1529_v26 = vpop.f32.mrf.mxu1  ;;  %v5345_v46 = vpop.f32.mrf.mxu3  ;;  %v1884_v44 = vmul.f32 %v1868_v4, %v1522_v24  ;;  %v1666_v62 = vadd.f32 %v1665_v23, %v1624_v34  ;;  %v1583_v59 = vadd.f32 %v5343_v39, %v5051_v22 }
 0x219   : > { %v1530_v17 = vadd.f32 %v1529_v26, %v1493_v3  ;;  %v1880_v45 = vmul.f32 %v1864_v51, %v1518_v19 }
 0x21a   : > { %2342 = vmatmul.f32.gmra.mxu0 %v5188_v27  ;;  %v5362_v15 = vand.u32 4294901760, %v1884_v44  ;;  %v1636_v34 = vadd.f32 %v5345_v46, %v1583_v59 }
 0x21b   : > { %v4125_v13 = vpop.eup %4124  ;;  %v1828_v55 = vmul.f32 %v5085_v38, %v1530_v17  ;;  %2379 = vmatmul.f32.vlgmr.msra.gmra.mxu1 %v5143_v2  ;;  %v5365_v61 = vand.u32 4294901760, %v1880_v45 }
 0x21c   : > { %v1856_v48 = vmul.f32 0.5, %v4125_v13  ;;  %v2561_v26 = vsub.f32 %v1884_v44, %v5362_v15 }
 0x21d   : > { %4126 = vtanh.f32 %v1828_v55  ;;  %v2567_v49 = vsub.f32 %v1880_v45, %v5365_v61 }
 0x21e   : > { %v1872_v47 = vadd.f32 0.5, %v1856_v48  ;;  %2467 = vmatmul.f32.vlgmr.msra.gmra.mxu3 %v5127_v32 }
 0x21f   : > { %2434 = vmatmul.f32.gmra.mxu2 %v5171_v33  ;;  %v1670_v25 = vpop.f32.mrf.mxu0  ;;  %v1758_v12 = vpop.f32.mrf.mxu2  ;;  %v2568_v36 = vand.u32 4294901760, %v2567_v49 }
 0x220   : > { %v1707_v56 = vpop.f32.mrf.mxu1  ;;  %v1795_v20 = vpop.f32.mrf.mxu3  ;;  %v1888_v5 = vmul.f32 %v1872_v47, %v1526_v7  ;;  %v1671_v50 = vadd.f32 %v1670_v25, %v1628_v31  ;;  %v2562_v47 = vand.u32 4294901760, %v2561_v26 }
 0x221   : > { %v1708_v52 = vadd.f32 %v1707_v56, %v1666_v62  ;;  %v2569_v31 = vsub.f32 %v2567_v49, %v2568_v36 }
 0x222   : > { %2347 = vmatmul.f32.gmra.mxu0 %v5201_v14  ;;  %v5359_v18 = vand.u32 4294901760, %v1888_v5  ;;  %v2563_v44 = vsub.f32 %v2561_v26, %v2562_v47 }
 0x223   : > { %v4127_v29 = vpop.eup %4126  ;;  %2385 = vmatmul.f32.gmra.mxu1 %v5197_v43  ;;  %v1759_v40 = vadd.f32 %v1758_v12, %v1708_v52  ;;  %v2570_v52 = vand.u32 4294901760, %v2569_v31 }
 0x224   : > { %v1860_v53 = vmul.f32 0.5, %v4127_v29  ;;  %v2555_v30 = vsub.f32 %v1888_v5, %v5359_v18 }
 0x225   : > { %v5385_v4 = vadd.f32 %v1795_v20, %v1759_v40 }
 0x226   : > { %v1876_v8 = vadd.f32 0.5, %v1860_v53  ;;  %2471 = vmatmul.f32.gmra.mxu3 %v5171_v33  ;;  %v2556_v13 = vand.u32 4294901760, %v2555_v30 }
 0x227   : > { %2438 = vmatmul.f32.gmra.mxu2 %v5190_v35  ;;  %v1762_v24 = vpop.f32.mrf.mxu2  ;;  %v1675_v23 = vpop.f32.mrf.mxu0  ;;  %v1817_v22 = vmul.f32 %v5085_v38, %v5385_v4 }
 0x228   : > { %v1892_v16 = vmul.f32 %v1876_v8, %v1530_v17  ;;  %v1713_v7 = vpop.f32.mrf.mxu1  ;;  %v1799_v60 = vpop.f32.mrf.mxu3  ;;  %v1676_v48 = vadd.f32 %v1675_v23, %v1632_v11  ;;  %v2557_v51 = vsub.f32 %v2555_v30, %v2556_v13 }
 0x229   : > { %v1714_v19 = vadd.f32 %v1713_v7, %v1671_v50  ;;  %v2564_v50 = vand.u32 4294901760, %v2563_v44 }
 0x22a   : > { %v5370_v3 = vand.u32 4294901760, %v1892_v16  ;;  %2352 = vmatmul.f32.gmra.mxu0 %v5224_v37  ;;  %v2558_v45 = vand.u32 4294901760, %v2557_v51 }
 0x22b   : > { %v1763_v63 = vadd.f32 %v1762_v24, %v1714_v19  ;;  %2391 = vmatmul.f32.gmra.mxu1 %v5208_v10 }
 0x22c   : > { %v2549_v17 = vsub.f32 %v1892_v16, %v5370_v3  ;;  %2496 = vmatpush.msrb.mxu0 %v5370_v3  ;;  %2647 = vmatpush.msrb.mxu3 %v5370_v3 }
 0x22d   : > { %v5380_v57 = vadd.f32 %v1799_v60, %v1763_v63 }
 0x22e   : > { %2498 = vmatpush.msrb.mxu0 %v5359_v18  ;;  %2603 = vmatpush.msrb.mxu2 %v2549_v17  ;;  %v2550_v55 = vand.u32 4294901760, %v2549_v17 }
 0x22f   : > { %2649 = vmatpush.msrb.mxu3 %v5359_v18  ;;  %2442 = vmatmul.f32.gmra.mxu2 %v5210_v42  ;;  %v1766_v41 = vpop.f32.mrf.mxu2  ;;  %v1821_v20 = vmul.f32 %v5085_v38, %v5380_v57  ;;  %v1680_v39 = vpop.f32.mrf.mxu0 }
 0x230   : > { %2475 = vmatmul.f32.gmra.mxu3 %v5190_v35  ;;  %v1719_v28 = vpop.f32.mrf.mxu1  ;;  %2500 = vmatpush.msrb.mxu0 %v5362_v15  ;;  %v1803_v25 = vpop.f32.mrf.mxu3  ;;  %v2551_v12 = vsub.f32 %v2549_v17, %v2550_v55  ;;  %v1681_v8 = vadd.f32 %v1680_v39, %v1636_v34 }
 0x231   : > { %v1720_v56 = vadd.f32 %v1719_v28, %v1676_v48  ;;  %2606 = vmatpush.msrb.mxu2 %v2555_v30  ;;  %2651 = vmatpush.msrb.mxu3 %v5362_v15  ;;  %4128 = vtanh.f32 %v1821_v20 }
 0x232   : > { %2502 = vmatpush.msrb.mxu0 %v5365_v61  ;;  %v2552_v5 = vand.u32 4294901760, %v2551_v12  ;;  %4130 = vtanh.f32 %v1817_v22 }
 0x233   : > { %v1767_v29 = vadd.f32 %v1766_v41, %v1720_v56  ;;  %2609 = vmatpush.msrb.mxu2 %v2561_v26  ;;  %2653 = vmatpush.msrb.mxu3 %v5365_v61 }
 0x234   : > { %2397 = vmatmul.f32.gmra.mxu1 %v5233_v0  ;;  %2508 = vmatmul.f32.vlgmr.msrb.gmra.mxu0 %v5166_v9 }
 0x235   : > { %2694 = vmatpush.msra.mxu0 %v2550_v55  ;;  %v1804_v53 = vadd.f32 %v1803_v25, %v1767_v29  ;;  %2553 = vmatpush.msrb.mxu1 %v2552_v5 }
 0x236   : > { %2612 = vmatpush.msrb.mxu2 %v2567_v49 }
 0x237   : > { %v1825_v62 = vmul.f32 %v5085_v38, %v1804_v53  ;;  %2698 = vmatpush.msra.mxu0 %v2556_v13  ;;  %2559 = vmatpush.msrb.mxu1 %v2558_v45  ;;  %v1770_v46 = vpop.f32.mrf.mxu2  ;;  %v4129_v54 = vpop.eup %4128 }
 0x238   : > { %2479 = vmatmul.f32.gmra.mxu3 %v5210_v42  ;;  %2615 = vmatmul.f32.vlgmr.msrb.gmra.mxu2 %v5133_v58  ;;  %v1725_v24 = vpop.f32.mrf.mxu1  ;;  %v1807_v7 = vpop.f32.mrf.mxu3  ;;  %v1853_v63 = vmul.f32 0.5, %v4129_v54 }
 0x239   : > { %4132 = vtanh.f32 %v1825_v62  ;;  %2702 = vmatpush.msra.mxu0 %v2562_v47  ;;  %v1726_v16 = vadd.f32 %v1725_v24, %v1681_v8  ;;  %2565 = vmatpush.msrb.mxu1 %v2564_v50  ;;  %v4131_v30 = vpop.eup %4130 }
 0x23a   : > { %v1849_v40 = vmul.f32 0.5, %v4131_v30  ;;  %v1869_v49 = vadd.f32 0.5, %v1853_v63  ;;  %v5453_v30 = vpop.permute.xlu0 %1904 }
 0x23b   : > { %2706 = vmatpush.msra.mxu0 %v2568_v36  ;;  %v1771_v60 = vadd.f32 %v1770_v46, %v1726_v16  ;;  %2571 = vmatpush.msrb.mxu1 %v2570_v52 }
 0x23c   : > { %2516 = vmatmul.f32.gmra.mxu0 %v5217_v1  ;;  %2573 = vmatmul.f32.vlgmr.msrb.gmra.mxu1 %v5127_v32  ;;  %v1885_v13 = vmul.f32 %v1869_v49, %v5380_v57 }
 0x23d   : > { %2737 = vmatpush.msra.mxu1 %v5370_v3  ;;  %v1808_v19 = vadd.f32 %v1807_v7, %v1771_v60  ;;  %v5446_v7 = vpop.permute.xlu1 %1912 }
 0x23e   : > { %v5419_v47 = vand.u32 4294901760, %v1885_v13 }
 0x23f   : > { %v4133_v23 = vpop.eup %4132  ;;  %v1829_v26 = vmul.f32 %v5085_v38, %v1808_v19  ;;  %2739 = vmatpush.msra.mxu1 %v5359_v18  ;;  %v1865_v38 = vadd.f32 0.5, %v1849_v40 }
 0x240   : > { %v1857_v17 = vmul.f32 0.5, %v4133_v23  ;;  %2620 = vmatmul.f32.gmra.mxu2 %v5188_v27  ;;  %2657 = vmatmul.f32.vlgmr.msrb.gmra.mxu3 %v5143_v2  ;;  %v2839_v59 = vsub.f32 %v1885_v13, %v5419_v47 }
 0x241   : > { %4134 = vtanh.f32 %v1829_v26  ;;  %2741 = vmatpush.msra.mxu1 %v5362_v15  ;;  %v1881_v15 = vmul.f32 %v1865_v38, %v5385_v4  ;;  %v5464_v38 = vpop.permute.xlu2 %1908 }
 0x242   : > { %v1873_v11 = vadd.f32 0.5, %v1857_v17  ;;  %v2840_v20 = vand.u32 4294901760, %v2839_v59 }
 0x243   : > { %2743 = vmatpush.msra.mxu1 %v5365_v61  ;;  %v5423_v28 = vand.u32 4294901760, %v1881_v15 }
 0x244   : > { %2524 = vmatmul.f32.gmra.mxu0 %v5230_v21  ;;  %2577 = vmatmul.f32.gmra.mxu1 %v5171_v33  ;;  %v1889_v3 = vmul.f32 %v1873_v11, %v1804_v53  ;;  %v2841_v53 = vsub.f32 %v2839_v59, %v2840_v20 }
 0x245   : > { %v2845_v4 = vsub.f32 %v1881_v15, %v5423_v28  ;;  %v5455_v23 = vpop.permute.xlu1 %1900 }
 0x246   : > { %v2775_v48 = vand.u32 4294901760, %v1889_v3  ;;  %v2842_v50 = vand.u32 4294901760, %v2841_v53 }
 0x247   : > { %v4135_v18 = vpop.eup %4134  ;;  %v2846_v44 = vand.u32 4294901760, %v2845_v4 }
 0x248   : > { %v1861_v55 = vmul.f32 0.5, %v4135_v18  ;;  %2625 = vmatmul.f32.gmra.mxu2 %v5201_v14  ;;  %2663 = vmatmul.f32.gmra.mxu3 %v5197_v43  ;;  %v2833_v25 = vsub.f32 %v1889_v3, %v2775_v48 }
 0x249   : > { %v2847_v8 = vsub.f32 %v2845_v4, %v2846_v44 }
 0x24a   : > { %v1877_v41 = vadd.f32 0.5, %v1861_v55  ;;  %v2834_v51 = vand.u32 4294901760, %v2833_v25 }
 0x24b   : > { %v2848_v24 = vand.u32 4294901760, %v2847_v8 }
 0x24c   : > { %v1893_v61 = vmul.f32 %v1877_v41, %v1808_v19  ;;  %2532 = vmatmul.f32.gmra.mxu0 %v5253_v6  ;;  %2581 = vmatmul.f32.gmra.mxu1 %v5190_v35  ;;  %v2835_v29 = vsub.f32 %v2833_v25, %v2834_v51 }
 0x24e   : > { %v2773_v57 = vand.u32 4294901760, %v1893_v61  ;;  %v5425_v12 = vpop.f32.mrf.mxu0  ;;  %v2836_v31 = vand.u32 4294901760, %v2835_v29 }
 0x250   : > { %v2827_v56 = vsub.f32 %v1893_v61, %v2773_v57  ;;  %2630 = vmatmul.f32.gmra.mxu2 %v5224_v37  ;;  %2669 = vmatmul.f32.gmra.mxu3 %v5208_v10 }
 0x251   : > { %2774 = vmatpush.msra.mxu2 %v2773_v57  ;;  %2925 = vmatpush.msrb.mxu1 %v2773_v57 }
 0x252   : > { %2881 = vmatpush.msrb.mxu0 %v2827_v56  ;;  %v2828_v36 = vand.u32 4294901760, %v2827_v56 }
 0x253   : > { %2776 = vmatpush.msra.mxu2 %v2775_v48  ;;  %2927 = vmatpush.msrb.mxu1 %v2775_v48 }
 0x254   : > { %2585 = vmatmul.f32.gmra.mxu1 %v5210_v42  ;;  %2708 = vmatmul.f32.vlgmr.msra.gmra.mxu0 %v5127_v32  ;;  %v2829_v5 = vsub.f32 %v2827_v56, %v2828_v36 }
 0x255   : > { %2778 = vmatpush.msra.mxu2 %v5419_v47  ;;  %2884 = vmatpush.msrb.mxu0 %v2833_v25 }
 0x256   : > { %2929 = vmatpush.msrb.mxu1 %v5419_v47  ;;  %v1961_v22 = vpop.f32.mrf.mxu0  ;;  %v2018_v39 = vpop.f32.mrf.mxu1  ;;  %v2830_v34 = vand.u32 4294901760, %v2829_v5 }
 0x257   : > { %2780 = vmatpush.msra.mxu2 %v5423_v28  ;;  %2887 = vmatpush.msrb.mxu0 %v2839_v59  ;;  %v2102_v62 = vpop.f32.mrf.mxu3  ;;  %v1962_v40 = vadd.f32 %v1961_v22, %v5453_v30 }
 0x258   : > { %2931 = vmatpush.msrb.mxu1 %v5423_v28  ;;  %2675 = vmatmul.f32.gmra.mxu3 %v5233_v0  ;;  %v2060_v45 = vpop.f32.mrf.mxu2 }
 0x259   : > { %2786 = vmatmul.f32.vlgmr.msra.gmra.mxu2 %v5166_v9  ;;  %2831 = vmatpush.msra.mxu3 %v2830_v34 }
 0x25a   : > { %2972 = vmatpush.msrb.mxu2 %v2828_v36  ;;  %2890 = vmatpush.msrb.mxu0 %v2845_v4  ;;  %v5478_v36 = vpop.permute.xlu2 %3040 }
 0x25b   : > { %2837 = vmatpush.msra.mxu3 %v2836_v31 }
 0x25c   : > { %2976 = vmatpush.msrb.mxu2 %v2834_v51  ;;  %2712 = vmatmul.f32.gmra.mxu0 %v5171_v33 }
 0x25d   : > { %2745 = vmatmul.f32.vlgmr.msra.gmra.mxu1 %v5127_v32  ;;  %2843 = vmatpush.msra.mxu3 %v2842_v50 }
 0x25e   : > { %2980 = vmatpush.msrb.mxu2 %v2840_v20  ;;  %v1969_v46 = vpop.f32.mrf.mxu0  ;;  %v2022_v16 = vpop.f32.mrf.mxu1 }
 0x25f   : > { %2849 = vmatpush.msra.mxu3 %v2848_v24  ;;  %v2108_v52 = vpop.f32.mrf.mxu3  ;;  %v2023_v11 = vadd.f32 %v2022_v16, %v1962_v40 }
 0x260   : > { %2984 = vmatpush.msrb.mxu2 %v2846_v44  ;;  %2851 = vmatmul.f32.vlgmr.msra.gmra.mxu3 %v5127_v32  ;;  %v2065_v9 = vpop.f32.mrf.mxu2 }
 0x261   : > { %2794 = vmatmul.f32.gmra.mxu2 %v5217_v1  ;;  %3015 = vmatpush.msrb.mxu3 %v2773_v57  ;;  %v2066_v55 = vadd.f32 %v2065_v9, %v2023_v11 }
 0x263   : > { %3017 = vmatpush.msrb.mxu3 %v2775_v48  ;;  %v2109_v41 = vadd.f32 %v2108_v52, %v2066_v55 }
 0x264   : > { %2716 = vmatmul.f32.gmra.mxu0 %v5190_v35 }
 0x265   : > { %2749 = vmatmul.f32.gmra.mxu1 %v5171_v33  ;;  %3019 = vmatpush.msrb.mxu3 %v5419_v47 }
 0x266   : > { %v1977_v60 = vpop.f32.mrf.mxu0  ;;  %v2026_v54 = vpop.f32.mrf.mxu1 }
 0x267   : > { %3021 = vmatpush.msrb.mxu3 %v5423_v28  ;;  %v2114_v1 = vpop.f32.mrf.mxu3 }
 0x268   : > { %2855 = vmatmul.f32.gmra.mxu3 %v5171_v33  ;;  %v2070_v19 = vpop.f32.mrf.mxu2 }
 0x269   : > { %2802 = vmatmul.f32.gmra.mxu2 %v5230_v21  ;;  %v1954_v21 = vadd.f32 %v5425_v12, %v5455_v23  ;;  %v1978_v12 = vadd.f32 %v1977_v60, %v5446_v7 }
 0x26b   : > { %v2019_v49 = vadd.f32 %v2018_v39, %v1954_v21 }
 0x26c   : > { %2720 = vmatmul.f32.gmra.mxu0 %v5210_v42 }
 0x26d   : > { %2753 = vmatmul.f32.gmra.mxu1 %v5190_v35  ;;  %v2061_v15 = vadd.f32 %v2060_v45, %v2019_v49 }
 0x26f   : > { %v2153_v63 = vpop.f32.mrf.mxu0  ;;  %v2120_v18 = vpop.f32.mrf.mxu3  ;;  %v2103_v47 = vadd.f32 %v2102_v62, %v2061_v15 }
 0x270   : > { %2859 = vmatmul.f32.gmra.mxu3 %v5190_v35  ;;  %v2030_v26 = vpop.f32.mrf.mxu1  ;;  %v2075_v17 = vpop.f32.mrf.mxu2 }
 0x271   : > { %2810 = vmatmul.f32.gmra.mxu2 %v5253_v6  ;;  %v1970_v6 = vadd.f32 %v1969_v46, %v5464_v38  ;;  %v2154_v25 = vadd.f32 %v2153_v63, %v2103_v47 }
 0x274   : > { %2893 = vmatmul.f32.vlgmr.msrb.gmra.mxu0 %v5133_v58  ;;  %v2027_v58 = vadd.f32 %v2026_v54, %v1970_v6 }
 0x275   : > { %2757 = vmatmul.f32.gmra.mxu1 %v5210_v42 }
 0x276   : > { %v2071_v59 = vadd.f32 %v2070_v19, %v2027_v58 }
 0x277   : > { %v2157_v3 = vpop.f32.mrf.mxu0 }
 0x278   : > { %2863 = vmatmul.f32.gmra.mxu3 %v5210_v42  ;;  %v2190_v13 = vpop.f32.mrf.mxu1  ;;  %v2158_v61 = vadd.f32 %v2157_v3, %v2109_v41  ;;  %v2115_v20 = vadd.f32 %v2114_v1, %v2071_v59 }
 0x279   : > { %2986 = vmatmul.f32.vlgmr.msrb.gmra.mxu2 %v5127_v32 }
 0x27a   : > { %v5469_v48 = vpop.f32.mrf.mxu2 }
 0x27c   : > { %2898 = vmatmul.f32.gmra.mxu0 %v5188_v27  ;;  %v2191_v27 = vadd.f32 %v2190_v13, %v2154_v25 }
 0x27d   : > { %2935 = vmatmul.f32.vlgmr.msrb.gmra.mxu1 %v5143_v2  ;;  %v2031_v2 = vadd.f32 %v2030_v26, %v1978_v12 }
 0x27f   : > { %v2161_v28 = vpop.f32.mrf.mxu0  ;;  %v2076_v39 = vadd.f32 %v2075_v17, %v2031_v2 }
 0x280   : > { %3023 = vmatmul.f32.vlgmr.msrb.gmra.mxu3 %v5127_v32  ;;  %v2194_v57 = vpop.f32.mrf.mxu1  ;;  %v3043_v32 = vmul.f32 %v5478_v36, %v2191_v27  ;;  %v2162_v29 = vadd.f32 %v2161_v28, %v2115_v20  ;;  %v3123_v20 = vld [vmem:[%s5717_s5] sm:$0x1] }
 0x281   : > { %2990 = vmatmul.f32.gmra.mxu2 %v5171_v33  ;;  %v2195_v56 = vadd.f32 %v2194_v57, %v2158_v61  ;;  %v5476_v4 = vpop.f32.mrf.mxu3 }
 0x282   : > { %v2239_v51 = vpop.f32.mrf.mxu2 }
 0x283   : > { %v3047_v5 = vmul.f32 %v5478_v36, %v2195_v56 }
 0x284   : > { %2903 = vmatmul.f32.gmra.mxu0 %v5201_v14 }
 0x285   : > { %2941 = vmatmul.f32.gmra.mxu1 %v5197_v43  ;;  %4136 = vtanh.f32 %v3047_v5  ;;  %v2121_v43 = vadd.f32 %v2120_v18, %v2076_v39 }
 0x286   : > { %4138 = vtanh.f32 %v3043_v32 }
 0x287   : > { %v2165_v44 = vpop.f32.mrf.mxu0 }
 0x288   : > { %3027 = vmatmul.f32.gmra.mxu3 %v5171_v33  ;;  %v2198_v22 = vpop.f32.mrf.mxu1  ;;  %v2166_v8 = vadd.f32 %v2165_v44, %v2121_v43 }
 0x289   : > { %2994 = vmatmul.f32.gmra.mxu2 %v5190_v35  ;;  %v2199_v34 = vadd.f32 %v2198_v22, %v2162_v29  ;;  %v2300_v53 = vpop.f32.mrf.mxu3 }
 0x28a   : > { %v2247_v14 = vpop.f32.mrf.mxu2 }
 0x28b   : > { %v3051_v45 = vmul.f32 %v5478_v36, %v2199_v34  ;;  %v4137_v31 = vpop.eup %4136  ;;  %v2248_v2 = vadd.f32 %v2247_v14, %v5464_v38 }
 0x28c   : > { %2908 = vmatmul.f32.gmra.mxu0 %v5224_v37  ;;  %v4139_v62 = vpop.eup %4138  ;;  %v3079_v16 = vmul.f32 0.5, %v4137_v31 }
 0x28d   : > { %4140 = vtanh.f32 %v3051_v45  ;;  %2947 = vmatmul.f32.gmra.mxu1 %v5208_v10  ;;  %v3075_v60 = vmul.f32 0.5, %v4139_v62  ;;  %v3132_v45 = vsel %vm685_vm0, %v3123_v20, 0 }
 0x28e   : > { %v3095_v54 = vadd.f32 0.5, %v3079_v16 }
 0x28f   : > { %v2338_v33 = vpop.f32.mrf.mxu0  ;;  %v3091_v1 = vadd.f32 0.5, %v3075_v60 }
 0x290   : > { %3031 = vmatmul.f32.gmra.mxu3 %v5190_v35  ;;  %v2202_v50 = vpop.f32.mrf.mxu1  ;;  %v3111_v40 = vmul.f32 %v3095_v54, %v2195_v56 }
 0x291   : > { %2998 = vmatmul.f32.gmra.mxu2 %v5210_v42  ;;  %v2203_v24 = vadd.f32 %v2202_v50, %v2166_v8  ;;  %v5491_v46 = vpop.f32.mrf.mxu3  ;;  %v3107_v49 = vmul.f32 %v3091_v1, %v2191_v27 }
 0x292   : > { %v5493_v9 = vpop.f32.mrf.mxu2  ;;  %v5502_v13 = vand.u32 4294901760, %v3111_v40  ;;  %v2305_v31 = vadd.f32 %v5491_v46, %v2248_v2 }
 0x293   : > { %v4141_v37 = vpop.eup %4140  ;;  %v3055_v52 = vmul.f32 %v5478_v36, %v2203_v24  ;;  %v5505_v15 = vand.u32 4294901760, %v3107_v49  ;;  %v2256_v46 = vadd.f32 %v5493_v9, %v5446_v7 }
 0x294   : > { %v3083_v10 = vmul.f32 0.5, %v4141_v37  ;;  %v3188_v12 = vsub.f32 %v3111_v40, %v5502_v13 }
 0x295   : > { %4142 = vtanh.f32 %v3055_v52  ;;  %2953 = vmatmul.f32.gmra.mxu1 %v5233_v0  ;;  %v2240_v0 = vadd.f32 %v2239_v51, %v5453_v30  ;;  %v3194_v59 = vsub.f32 %v3107_v49, %v5505_v15 }
 0x296   : > { %v3099_v19 = vadd.f32 0.5, %v3083_v10  ;;  %v3189_v29 = vand.u32 4294901760, %v3188_v12  ;;  %v5532_v10 = vand.u32 4294901760, %v3132_v45 }
 0x297   : > { %v2343_v35 = vpop.f32.mrf.mxu0  ;;  %v2301_v28 = vadd.f32 %v2300_v53, %v2240_v0  ;;  %v3195_v22 = vand.u32 4294901760, %v3194_v59 }
 0x298   : > { %v3115_v63 = vmul.f32 %v3099_v19, %v2199_v34  ;;  %3035 = vmatmul.f32.gmra.mxu3 %v5210_v42  ;;  %v2380_v26 = vpop.f32.mrf.mxu1  ;;  %v2232_v42 = vadd.f32 %v5469_v48, %v5455_v23  ;;  %v3190_v50 = vsub.f32 %v3188_v12, %v3189_v29 }
 0x299   : > { %v5498_v17 = vpop.f32.mrf.mxu3  ;;  %v2344_v51 = vadd.f32 %v2343_v35, %v2301_v28 }
 0x29a   : > { %v2431_v21 = vpop.f32.mrf.mxu2  ;;  %v5500_v3 = vand.u32 4294901760, %v3115_v63  ;;  %v2297_v56 = vadd.f32 %v5476_v4, %v2232_v42  ;;  %v3191_v35 = vand.u32 4294901760, %v3190_v50 }
 0x29b   : > { %v4143_v11 = vpop.eup %4142 }
 0x29c   : > { %v3087_v18 = vmul.f32 0.5, %v4143_v11  ;;  %v3182_v47 = vsub.f32 %v3115_v63, %v5500_v3  ;;  %v2339_v5 = vadd.f32 %v2338_v33, %v2297_v56 }
 0x29e   : > { %v3103_v6 = vadd.f32 0.5, %v3087_v18  ;;  %v3183_v48 = vand.u32 4294901760, %v3182_v47  ;;  %v2381_v39 = vadd.f32 %v2380_v26, %v2339_v5  ;;  %v5543_v18 = vsub.f32 %v3132_v45, %v5532_v10 }
 0x29f   : > { %v2348_v55 = vpop.f32.mrf.mxu0 }
 0x2a0   : > { %v3119_v58 = vmul.f32 %v3103_v6, %v2203_v24  ;;  %v2386_v41 = vpop.f32.mrf.mxu1  ;;  %v3184_v14 = vsub.f32 %v3182_v47, %v3183_v48  ;;  %v3196_v24 = vsub.f32 %v3194_v59, %v3195_v22  ;;  %v2432_v16 = vadd.f32 %v2431_v21, %v2381_v39 }
 0x2a1   : > { %v2468_v61 = vpop.f32.mrf.mxu3  ;;  %v2387_v32 = vadd.f32 %v2386_v41, %v2344_v51  ;;  %v2349_v37 = vadd.f32 %v2348_v55, %v2305_v31  ;;  %v2309_v21 = vadd.f32 %v5498_v17, %v2256_v46  ;;  %v5548_v42 = vand.u32 4294901760, %v5543_v18 }
 0x2a2   : > { %v5510_v25 = vand.u32 4294901760, %v3119_v58  ;;  %v2435_v57 = vpop.f32.mrf.mxu2  ;;  %v3185_v60 = vand.u32 4294901760, %v3184_v14  ;;  %v2469_v54 = vadd.f32 %v2468_v61, %v2432_v16  ;;  %v3197_v63 = vand.u32 4294901760, %v3196_v24 }
 0x2a3   : > { %v2436_v8 = vadd.f32 %v2435_v57, %v2387_v32  ;;  %v3157_v41 = vsub.f32 %v5543_v18, %v5548_v42 }
 0x2a4   : > { %v3176_v27 = vsub.f32 %v3119_v58, %v5510_v25  ;;  %3147 = vmatpush.msra.mxu0 %v5510_v25  ;;  %3247 = vmatpush.msra.mxu3 %v5510_v25  ;;  %v3044_v11 = vmul.f32 %v5478_v36, %v2469_v54 }
 0x2a6   : > { %3149 = vmatpush.msra.mxu0 %v5500_v3  ;;  %3218 = vmatpush.msra.mxu2 %v3176_v27  ;;  %v3177_v4 = vand.u32 4294901760, %v3176_v27 }
 0x2a7   : > { %3249 = vmatpush.msra.mxu3 %v5500_v3  ;;  %v2353_v44 = vpop.f32.mrf.mxu0 }
 0x2a8   : > { %v2392_v34 = vpop.f32.mrf.mxu1  ;;  %3151 = vmatpush.msra.mxu0 %v5502_v13  ;;  %3221 = vmatpush.msra.mxu2 %v3182_v47  ;;  %v3178_v53 = vsub.f32 %v3176_v27, %v3177_v4  ;;  %v2354_v6 = vadd.f32 %v2353_v44, %v2309_v21  ;;  %v5557_v47 = vand.u32 4294901760, %v3157_v41 }
 0x2a9   : > { %3251 = vmatpush.msra.mxu3 %v5502_v13  ;;  %v2472_v43 = vpop.f32.mrf.mxu3  ;;  %v2393_v19 = vadd.f32 %v2392_v34, %v2349_v37 }
 0x2aa   : > { %v2439_v33 = vpop.f32.mrf.mxu2  ;;  %3153 = vmatpush.msra.mxu0 %v5505_v15  ;;  %3224 = vmatpush.msra.mxu2 %v3188_v12  ;;  %v3179_v62 = vand.u32 4294901760, %v3178_v53  ;;  %v5530_v52 = vadd.f32 %v2472_v43, %v2436_v8 }
 0x2ab   : > { %3253 = vmatpush.msra.mxu3 %v5505_v15  ;;  %v2440_v49 = vadd.f32 %v2439_v33, %v2393_v19  ;;  %3159 = vmatmul.f32.vlgmr.msra.gmra.mxu0 %v5557_v47 }
 0x2ac   : > { %3276 = vmatpush.msrb.mxu0 %v3177_v4  ;;  %3180 = vmatpush.msra.mxu1 %v3179_v62  ;;  %v3048_v1 = vmul.f32 %v5478_v36, %v5530_v52 }
 0x2ad   : > { %3227 = vmatpush.msra.mxu2 %v3194_v59  ;;  %3257 = vmatmul.f32.vlgmr.msra.gmra.mxu3 %v5548_v42 }
 0x2ae   : > { %3280 = vmatpush.msrb.mxu0 %v3183_v48  ;;  %3186 = vmatpush.msra.mxu1 %v3185_v60  ;;  %4144 = vtanh.f32 %v3048_v1 }
 0x2af   : > { %3230 = vmatmul.f32.vlgmr.msra.gmra.mxu2 %v5543_v18  ;;  %4146 = vtanh.f32 %v3044_v11 }
 0x2b0   : > { %3284 = vmatpush.msrb.mxu0 %v3189_v29  ;;  %3192 = vmatpush.msra.mxu1 %v3191_v35 }
 0x2b1   : > { %v2398_v26 = vpop.f32.mrf.mxu1  ;;  %v5538_v40 = vpop.f32.mrf.mxu0 }
 0x2b2   : > { %3288 = vmatpush.msrb.mxu0 %v3195_v22  ;;  %v2443_v9 = vpop.f32.mrf.mxu2  ;;  %3198 = vmatpush.msra.mxu1 %v3197_v63  ;;  %v2399_v17 = vadd.f32 %v2398_v26, %v2354_v6 }
 0x2b3   : > { %v2476_v0 = vpop.f32.mrf.mxu3  ;;  %3200 = vmatmul.f32.vlgmr.msra.gmra.mxu1 %v5532_v10  ;;  %3290 = vmatmul.f32.vlgmr.msrb.gmra.mxu0 %v5532_v10 }
 0x2b4   : > { %3307 = vmatpush.msrb.mxu1 %v5510_v25  ;;  %v2477_v55 = vadd.f32 %v2476_v0, %v2440_v49  ;;  %v2444_v25 = vadd.f32 %v2443_v9, %v2399_v17 }
 0x2b6   : > { %3309 = vmatpush.msrb.mxu1 %v5500_v3  ;;  %v3052_v58 = vmul.f32 %v5478_v36, %v2477_v55  ;;  %v4145_v3 = vpop.eup %4144 }
 0x2b7   : > { %v4147_v59 = vpop.eup %4146 }
 0x2b8   : > { %3311 = vmatpush.msrb.mxu1 %v5502_v13  ;;  %4148 = vtanh.f32 %v3052_v58  ;;  %v3080_v13 = vmul.f32 0.5, %v4145_v3  ;;  %v3076_v48 = vmul.f32 0.5, %v4147_v59 }
 0x2b9   : > { %v2517_v61 = vpop.f32.mrf.mxu0  ;;  %v5559_v28 = vpop.f32.mrf.mxu1 }
 0x2ba   : > { %3313 = vmatpush.msrb.mxu1 %v5505_v15  ;;  %v3096_v20 = vadd.f32 0.5, %v3080_v13  ;;  %v3092_v4 = vadd.f32 0.5, %v3076_v48  ;;  %v2518_v21 = vadd.f32 %v2517_v61, %v5453_v30 }
 0x2bb   : > { %v2480_v57 = vpop.f32.mrf.mxu3  ;;  %v5563_v12 = vpop.f32.mrf.mxu2  ;;  %3315 = vmatmul.f32.vlgmr.msrb.gmra.mxu1 %v5532_v10 }
 0x2bc   : > { %v2481_v56 = vadd.f32 %v2480_v57, %v2444_v25  ;;  %v3112_v39 = vmul.f32 %v3096_v20, %v5530_v52  ;;  %v3108_v53 = vmul.f32 %v3092_v4, %v2469_v54 }
 0x2be   : > { %v4149_v27 = vpop.eup %4148  ;;  %v3056_v51 = vmul.f32 %v5478_v36, %v2481_v56  ;;  %v5575_v43 = vand.u32 4294901760, %v3112_v39  ;;  %v5579_v62 = vand.u32 4294901760, %v3108_v53 }
 0x2bf   : > { %v3084_v2 = vmul.f32 0.5, %v4149_v27 }
 0x2c0   : > { %4150 = vtanh.f32 %v3056_v51  ;;  %v3373_v60 = vsub.f32 %v3112_v39, %v5575_v43  ;;  %v3379_v54 = vsub.f32 %v3108_v53, %v5579_v62 }
 0x2c1   : > { %v3100_v15 = vadd.f32 0.5, %v3084_v2  ;;  %v5567_v5 = vpop.f32.mrf.mxu0  ;;  %v2578_v32 = vpop.f32.mrf.mxu1 }
 0x2c2   : > { %v3374_v26 = vand.u32 4294901760, %v3373_v60  ;;  %v3380_v6 = vand.u32 4294901760, %v3379_v54  ;;  %v2579_v41 = vadd.f32 %v2578_v32, %v2518_v21 }
 0x2c3   : > { %v3116_v29 = vmul.f32 %v3100_v15, %v2477_v55  ;;  %v2621_v44 = vpop.f32.mrf.mxu2  ;;  %v5570_v22 = vpop.f32.mrf.mxu3  ;;  %v2510_v55 = vadd.f32 %v5538_v40, %v5455_v23 }
 0x2c4   : > { %v3375_v58 = vsub.f32 %v3373_v60, %v3374_v26  ;;  %v3381_v3 = vsub.f32 %v3379_v54, %v3380_v6  ;;  %v2622_v13 = vadd.f32 %v2621_v44, %v2579_v41 }
 0x2c5   : > { %v5573_v14 = vand.u32 4294901760, %v3116_v29  ;;  %v2575_v25 = vadd.f32 %v5559_v28, %v2510_v55 }
 0x2c6   : > { %v4151_v34 = vpop.eup %4150  ;;  %v3376_v57 = vand.u32 4294901760, %v3375_v58  ;;  %v3382_v51 = vand.u32 4294901760, %v3381_v3 }
 0x2c7   : > { %v3088_v45 = vmul.f32 0.5, %v4151_v34  ;;  %v3367_v37 = vsub.f32 %v3116_v29, %v5573_v14  ;;  %v2617_v28 = vadd.f32 %v5563_v12, %v2575_v25 }
 0x2c9   : > { %v3104_v31 = vadd.f32 0.5, %v3088_v45  ;;  %v5577_v8 = vpop.f32.mrf.mxu0  ;;  %v2582_v33 = vpop.f32.mrf.mxu1  ;;  %v3368_v19 = vand.u32 4294901760, %v3367_v37  ;;  %v2659_v15 = vadd.f32 %v5570_v22, %v2617_v28 }
 0x2ca   : > { %v2534_v12 = vadd.f32 %v5577_v8, %v5446_v7 }
 0x2cb   : > { %v3120_v50 = vmul.f32 %v3104_v31, %v2481_v56  ;;  %v5581_v24 = vpop.f32.mrf.mxu2  ;;  %v2664_v16 = vpop.f32.mrf.mxu3  ;;  %v3369_v0 = vsub.f32 %v3367_v37, %v3368_v19  ;;  %v2526_v56 = vadd.f32 %v5567_v5, %v5464_v38 }
 0x2cc   : > { %v2665_v20 = vadd.f32 %v2664_v16, %v2622_v13 }
 0x2cd   : > { %v3331_v52 = vand.u32 4294901760, %v3120_v50  ;;  %v3370_v61 = vand.u32 4294901760, %v3369_v0  ;;  %v2583_v2 = vadd.f32 %v2582_v33, %v2526_v56 }
 0x2cf   : > { %v3361_v46 = vsub.f32 %v3120_v50, %v3331_v52  ;;  %3332 = vmatpush.msrb.mxu2 %v3331_v52  ;;  %3432 = vmatpush.msra.mxu1 %v3331_v52  ;;  %v2627_v44 = vadd.f32 %v5581_v24, %v2583_v2 }
 0x2d1   : > { %v5586_v35 = vpop.f32.mrf.mxu1  ;;  %v2709_v1 = vpop.f32.mrf.mxu0  ;;  %3334 = vmatpush.msrb.mxu2 %v5573_v14  ;;  %3403 = vmatpush.msra.mxu0 %v3361_v46  ;;  %v3362_v63 = vand.u32 4294901760, %v3361_v46 }
 0x2d2   : > { %3434 = vmatpush.msra.mxu1 %v5573_v14  ;;  %v2710_v4 = vadd.f32 %v2709_v1, %v2659_v15 }
 0x2d3   : > { %v5591_v11 = vpop.f32.mrf.mxu2  ;;  %v2670_v49 = vpop.f32.mrf.mxu3  ;;  %3336 = vmatpush.msrb.mxu2 %v5575_v43  ;;  %3406 = vmatpush.msra.mxu0 %v3367_v37  ;;  %v3363_v9 = vsub.f32 %v3361_v46, %v3362_v63 }
 0x2d4   : > { %3436 = vmatpush.msra.mxu1 %v5575_v43  ;;  %v2671_v31 = vadd.f32 %v2670_v49, %v2627_v44 }
 0x2d5   : > { %3338 = vmatpush.msrb.mxu2 %v5579_v62  ;;  %3409 = vmatpush.msra.mxu0 %v3373_v60  ;;  %v3364_v17 = vand.u32 4294901760, %v3363_v9 }
 0x2d6   : > { %3438 = vmatpush.msra.mxu1 %v5579_v62  ;;  %3344 = vmatmul.f32.vlgmr.msrb.gmra.mxu2 %v5557_v47 }
 0x2d7   : > { %3461 = vmatpush.msra.mxu2 %v3362_v63  ;;  %3365 = vmatpush.msrb.mxu3 %v3364_v17 }
 0x2d8   : > { %3412 = vmatpush.msra.mxu0 %v3379_v54  ;;  %3442 = vmatmul.f32.vlgmr.msra.gmra.mxu1 %v5548_v42 }
 0x2d9   : > { %3465 = vmatpush.msra.mxu2 %v3368_v19  ;;  %3415 = vmatmul.f32.vlgmr.msra.gmra.mxu0 %v5543_v18  ;;  %v2713_v40 = vpop.f32.mrf.mxu0 }
 0x2da   : > { %3371 = vmatpush.msrb.mxu3 %v3370_v61  ;;  %v2746_v59 = vpop.f32.mrf.mxu1  ;;  %v2714_v5 = vadd.f32 %v2713_v40, %v2665_v20 }
 0x2db   : > { %3469 = vmatpush.msra.mxu2 %v3374_v26  ;;  %v2676_v27 = vpop.f32.mrf.mxu3  ;;  %v2747_v53 = vadd.f32 %v2746_v59, %v2710_v4 }
 0x2dc   : > { %3377 = vmatpush.msrb.mxu3 %v3376_v57  ;;  %v5606_v48 = vpop.f32.mrf.mxu2 }
 0x2dd   : > { %3473 = vmatpush.msra.mxu2 %v3380_v6  ;;  %v2788_v2 = vadd.f32 %v5606_v48, %v5455_v23 }
 0x2de   : > { %3383 = vmatpush.msrb.mxu3 %v3382_v51  ;;  %3475 = vmatmul.f32.vlgmr.msra.gmra.mxu2 %v5532_v10 }
 0x2df   : > { %3385 = vmatmul.f32.vlgmr.msrb.gmra.mxu3 %v5532_v10 }
 0x2e0   : > { %3492 = vmatpush.msra.mxu3 %v3331_v52 }
 0x2e1   : > { %v2717_v32 = vpop.f32.mrf.mxu0 }
 0x2e2   : > { %3494 = vmatpush.msra.mxu3 %v5573_v14  ;;  %v2750_v29 = vpop.f32.mrf.mxu1  ;;  %v2587_v14 = vadd.f32 %v5586_v35, %v2534_v12  ;;  %v2718_v33 = vadd.f32 %v2717_v32, %v2671_v31 }
 0x2e3   : > { %v2751_v39 = vadd.f32 %v2750_v29, %v2714_v5  ;;  %v2852_v34 = vpop.f32.mrf.mxu3 }
 0x2e4   : > { %3496 = vmatpush.msra.mxu3 %v5575_v43  ;;  %v2795_v45 = vpop.f32.mrf.mxu2  ;;  %v3045_v43 = vmul.f32 %v5478_v36, %v2747_v53  ;;  %v2632_v24 = vadd.f32 %v5591_v11, %v2587_v14 }
 0x2e5   : > { %v3049_v22 = vmul.f32 %v5478_v36, %v2751_v39  ;;  %v2796_v13 = vadd.f32 %v2795_v45, %v5453_v30  ;;  %v2853_v30 = vadd.f32 %v2852_v34, %v2788_v2 }
 0x2e6   : > { %3498 = vmatpush.msra.mxu3 %v5579_v62  ;;  %v2677_v60 = vadd.f32 %v2676_v27, %v2632_v24 }
 0x2e7   : > { %3500 = vmatmul.f32.vlgmr.msra.gmra.mxu3 %v5532_v10  ;;  %4152 = vtanh.f32 %v3049_v22 }
 0x2e8   : > { %4154 = vtanh.f32 %v3045_v43 }
 0x2e9   : > { %v2721_v50 = vpop.f32.mrf.mxu0 }
 0x2ea   : > { %v2754_v8 = vpop.f32.mrf.mxu1  ;;  %v2722_v54 = vadd.f32 %v2721_v50, %v2677_v60 }
 0x2eb   : > { %v2755_v16 = vadd.f32 %v2754_v8, %v2718_v33  ;;  %v2856_v37 = vpop.f32.mrf.mxu3 }
 0x2ec   : > { %v2803_v52 = vpop.f32.mrf.mxu2  ;;  %v2857_v5 = vadd.f32 %v2856_v37, %v2796_v13 }
 0x2ed   : > { %v3053_v62 = vmul.f32 %v5478_v36, %v2755_v16  ;;  %v4153_v46 = vpop.eup %4152  ;;  %v2804_v22 = vadd.f32 %v2803_v52, %v5464_v38 }
 0x2ee   : > { %v4155_v19 = vpop.eup %4154  ;;  %v3081_v1 = vmul.f32 0.5, %v4153_v46 }
 0x2ef   : > { %4156 = vtanh.f32 %v3053_v62  ;;  %v3077_v11 = vmul.f32 0.5, %v4155_v19 }
 0x2f0   : > { %v3097_v55 = vadd.f32 0.5, %v3081_v1 }
 0x2f1   : > { %v2894_v26 = vpop.f32.mrf.mxu0  ;;  %v3093_v58 = vadd.f32 0.5, %v3077_v11 }
 0x2f2   : > { %v2758_v35 = vpop.f32.mrf.mxu1  ;;  %v3113_v3 = vmul.f32 %v3097_v55, %v2751_v39  ;;  %v2895_v14 = vadd.f32 %v2894_v26, %v2853_v30 }
 0x2f3   : > { %v2759_v63 = vadd.f32 %v2758_v35, %v2722_v54  ;;  %v2860_v21 = vpop.f32.mrf.mxu3  ;;  %v3109_v59 = vmul.f32 %v3093_v58, %v2747_v53 }
 0x2f4   : > { %v5623_v49 = vpop.f32.mrf.mxu2  ;;  %v5631_v28 = vand.u32 4294901760, %v3113_v3  ;;  %v2861_v24 = vadd.f32 %v2860_v21, %v2804_v22 }
 0x2f5   : > { %v4157_v9 = vpop.eup %4156  ;;  %v3057_v0 = vmul.f32 %v5478_v36, %v2759_v63  ;;  %v5635_v15 = vand.u32 4294901760, %v3109_v59 }
 0x2f6   : > { %v3085_v6 = vmul.f32 0.5, %v4157_v9  ;;  %v3558_v44 = vsub.f32 %v3113_v3, %v5631_v28 }
 0x2f7   : > { %4158 = vtanh.f32 %v3057_v0  ;;  %v3564_v23 = vsub.f32 %v3109_v59, %v5635_v15  ;;  %v2812_v0 = vadd.f32 %v5623_v49, %v5446_v7 }
 0x2f8   : > { %v3101_v17 = vadd.f32 0.5, %v3085_v6  ;;  %v3559_v50 = vand.u32 4294901760, %v3558_v44 }
 0x2f9   : > { %v2899_v56 = vpop.f32.mrf.mxu0  ;;  %v3565_v62 = vand.u32 4294901760, %v3564_v23 }
 0x2fa   : > { %v3117_v41 = vmul.f32 %v3101_v17, %v2755_v16  ;;  %v2936_v61 = vpop.f32.mrf.mxu1  ;;  %v2900_v53 = vadd.f32 %v2899_v56, %v2857_v5  ;;  %v3560_v46 = vsub.f32 %v3558_v44, %v3559_v50 }
 0x2fb   : > { %v5626_v25 = vpop.f32.mrf.mxu3  ;;  %v2937_v34 = vadd.f32 %v2936_v61, %v2895_v14  ;;  %v3566_v11 = vsub.f32 %v3564_v23, %v3565_v62 }
 0x2fc   : > { %v2987_v40 = vpop.f32.mrf.mxu2  ;;  %v5629_v27 = vand.u32 4294901760, %v3117_v41  ;;  %v3561_v55 = vand.u32 4294901760, %v3560_v46  ;;  %v2865_v58 = vadd.f32 %v5626_v25, %v2812_v0 }
 0x2fd   : > { %v4159_v57 = vpop.eup %4158  ;;  %v2988_v54 = vadd.f32 %v2987_v40, %v2937_v34  ;;  %v3567_v3 = vand.u32 4294901760, %v3566_v11 }
 0x2fe   : > { %v3089_v51 = vmul.f32 0.5, %v4159_v57  ;;  %v3552_v29 = vsub.f32 %v3117_v41, %v5629_v27 }
 0x300   : > { %v3105_v20 = vadd.f32 0.5, %v3089_v51  ;;  %v3553_v43 = vand.u32 4294901760, %v3552_v29 }
 0x301   : > { %v2904_v33 = vpop.f32.mrf.mxu0 }
 0x302   : > { %v3121_v32 = vmul.f32 %v3105_v20, %v2759_v63  ;;  %v2942_v4 = vpop.f32.mrf.mxu1  ;;  %v3554_v52 = vsub.f32 %v3552_v29, %v3553_v43  ;;  %v2905_v19 = vadd.f32 %v2904_v33, %v2861_v24 }
 0x303   : > { %v3024_v12 = vpop.f32.mrf.mxu3  ;;  %v2943_v31 = vadd.f32 %v2942_v4, %v2900_v53  ;;  %v3124_v4 = vld [vmem:[#allocation2] sm:$0x1] }
 0x304   : > { %v5639_v39 = vand.u32 4294901760, %v3121_v32  ;;  %v2991_v45 = vpop.f32.mrf.mxu2  ;;  %v3025_v26 = vadd.f32 %v3024_v12, %v2988_v54  ;;  %v3555_v9 = vand.u32 4294901760, %v3554_v52  ;;  %3127 = vperm.xlu1 %4070, %v3124_v4  }
 0x305   : > { %v2992_v38 = vadd.f32 %v2991_v45, %v2943_v31 }
 0x306   : > { %v3546_v48 = vsub.f32 %v3121_v32, %v5639_v39  ;;  %3517 = vmatpush.msrb.mxu0 %v5639_v39  ;;  %3617 = vmatpush.msrb.mxu3 %v5639_v39  ;;  %v3046_v41 = vmul.f32 %v5478_v36, %v3025_v26 }
 0x308   : > { %3519 = vmatpush.msrb.mxu0 %v5629_v27  ;;  %3588 = vmatpush.msrb.mxu2 %v3546_v48  ;;  %v3547_v8 = vand.u32 4294901760, %v3546_v48 }
 0x309   : > { %3619 = vmatpush.msrb.mxu3 %v5629_v27  ;;  %v2909_v17 = vpop.f32.mrf.mxu0 }
 0x30a   : > { %v2948_v16 = vpop.f32.mrf.mxu1  ;;  %3521 = vmatpush.msrb.mxu0 %v5631_v28  ;;  %3591 = vmatpush.msrb.mxu2 %v3552_v29  ;;  %v3548_v37 = vsub.f32 %v3546_v48, %v3547_v8  ;;  %v2910_v49 = vadd.f32 %v2909_v17, %v2865_v58 }
 0x30b   : > { %3621 = vmatpush.msrb.mxu3 %v5631_v28  ;;  %v3028_v60 = vpop.f32.mrf.mxu3  ;;  %v2949_v21 = vadd.f32 %v2948_v16, %v2905_v19 }
 0x30c   : > { %v5650_v35 = vadd.f32 %v3028_v60, %v2992_v38  ;;  %3523 = vmatpush.msrb.mxu0 %v5635_v15  ;;  %3594 = vmatpush.msrb.mxu2 %v3558_v44  ;;  %v3549_v1 = vand.u32 4294901760, %v3548_v37  ;;  %v2995_v63 = vpop.f32.mrf.mxu2 }
 0x30d   : > { %3623 = vmatpush.msrb.mxu3 %v5635_v15  ;;  %3529 = vmatmul.f32.vlgmr.msrb.gmra.mxu0 %v5557_v47  ;;  %v2996_v61 = vadd.f32 %v2995_v63, %v2949_v21 }
 0x30e   : > { %3646 = vmatpush.msra.mxu0 %v3547_v8  ;;  %3550 = vmatpush.msrb.mxu1 %v3549_v1  ;;  %v3050_v6 = vmul.f32 %v5478_v36, %v5650_v35 }
 0x30f   : > { %3597 = vmatpush.msrb.mxu2 %v3564_v23  ;;  %3627 = vmatmul.f32.vlgmr.msrb.gmra.mxu3 %v5548_v42 }
 0x310   : > { %3650 = vmatpush.msra.mxu0 %v3553_v43  ;;  %3600 = vmatmul.f32.vlgmr.msrb.gmra.mxu2 %v5543_v18  ;;  %4160 = vtanh.f32 %v3050_v6 }
 0x311   : > { %3556 = vmatpush.msrb.mxu1 %v3555_v9  ;;  %4162 = vtanh.f32 %v3046_v41 }
 0x312   : > { %3654 = vmatpush.msra.mxu0 %v3559_v50  ;;  %v2954_v40 = vpop.f32.mrf.mxu1 }
 0x313   : > { %3562 = vmatpush.msrb.mxu1 %v3561_v55  ;;  %v3032_v7 = vpop.f32.mrf.mxu3  ;;  %v2955_v59 = vadd.f32 %v2954_v40, %v2910_v49 }
 0x314   : > { %3658 = vmatpush.msra.mxu0 %v3565_v62  ;;  %v3033_v57 = vadd.f32 %v3032_v7, %v2996_v61  ;;  %v2999_v25 = vpop.f32.mrf.mxu2 }
 0x315   : > { %3568 = vmatpush.msrb.mxu1 %v3567_v3  ;;  %3660 = vmatmul.f32.vlgmr.msra.gmra.mxu0 %v5532_v10  ;;  %v3000_v51 = vadd.f32 %v2999_v25, %v2955_v59 }
 0x316   : > { %v3054_v56 = vmul.f32 %v5478_v36, %v3033_v57  ;;  %3570 = vmatmul.f32.vlgmr.msrb.gmra.mxu1 %v5532_v10  ;;  %v4161_v13 = vpop.eup %4160 }
 0x317   : > { %3677 = vmatpush.msra.mxu1 %v5639_v39  ;;  %v4163_v20 = vpop.eup %4162  ;;  %v3082_v32 = vmul.f32 0.5, %v4161_v13 }
 0x318   : > { %4164 = vtanh.f32 %v3054_v56 }
 0x319   : > { %3679 = vmatpush.msra.mxu1 %v5629_v27  ;;  %v3078_v27 = vmul.f32 0.5, %v4163_v20  ;;  %v3098_v30 = vadd.f32 0.5, %v3082_v32 }
 0x31b   : > { %3681 = vmatpush.msra.mxu1 %v5631_v28  ;;  %v3036_v2 = vpop.f32.mrf.mxu3  ;;  %v3094_v39 = vadd.f32 0.5, %v3078_v27 }
 0x31c   : > { %v3037_v5 = vadd.f32 %v3036_v2, %v3000_v51 }
 0x31d   : > { %3683 = vmatpush.msra.mxu1 %v5635_v15  ;;  %v3114_v15 = vmul.f32 %v3098_v30, %v5650_v35  ;;  %v3110_v22 = vmul.f32 %v3094_v39, %v3025_v26 }
 0x31e   : > { %v4165_v29 = vpop.eup %4164  ;;  %v3058_v12 = vmul.f32 %v5478_v36, %v3037_v5  ;;  %3685 = vmatmul.f32.vlgmr.msra.gmra.mxu1 %v5532_v10 }
 0x31f   : > { %v3086_v44 = vmul.f32 0.5, %v4165_v29  ;;  %v3705_v14 = vand.u32 4294901760, %v3114_v15  ;;  %v3707_v43 = vand.u32 4294901760, %v3110_v22 }
 0x320   : > { %4166 = vtanh.f32 %v3058_v12 }
 0x321   : > { %v3102_v28 = vadd.f32 0.5, %v3086_v44  ;;  %v3743_v34 = vsub.f32 %v3114_v15, %v3705_v14  ;;  %v3749_v24 = vsub.f32 %v3110_v22, %v3707_v43 }
 0x323   : > { %v3118_v53 = vmul.f32 %v3102_v28, %v3033_v57  ;;  %v3744_v37 = vand.u32 4294901760, %v3743_v34  ;;  %v3750_v60 = vand.u32 4294901760, %v3749_v24 }
 0x325   : > { %v3703_v23 = vand.u32 4294901760, %v3118_v53  ;;  %v3745_v54 = vsub.f32 %v3743_v34, %v3744_v37  ;;  %v3751_v35 = vsub.f32 %v3749_v24, %v3750_v60 }
 0x326   : > { %v4167_v45 = vpop.eup %4166 }
 0x327   : > { %v3090_v48 = vmul.f32 0.5, %v4167_v45  ;;  %v3737_v33 = vsub.f32 %v3118_v53, %v3703_v23  ;;  %v3746_v1 = vand.u32 4294901760, %v3745_v54  ;;  %v3752_v63 = vand.u32 4294901760, %v3751_v35 }
 0x329   : > { %v3106_v31 = vadd.f32 0.5, %v3090_v48  ;;  %v3738_v38 = vand.u32 4294901760, %v3737_v33 }
 0x32b   : > { %v3122_v36 = vmul.f32 %v3106_v31, %v3037_v5  ;;  %v3739_v62 = vsub.f32 %v3737_v33, %v3738_v38 }
 0x32d   : > { %v3701_v50 = vand.u32 4294901760, %v3122_v36  ;;  %v3740_v19 = vand.u32 4294901760, %v3739_v62 }
 0x32f   : > { %v3731_v8 = vsub.f32 %v3122_v36, %v3701_v50  ;;  %3702 = vmatpush.msra.mxu2 %v3701_v50  ;;  %3802 = vmatpush.msrb.mxu1 %v3701_v50 }
 0x330   : > { %v3201_v26 = vpop.f32.mrf.mxu1  ;;  %v3258_v21 = vpop.f32.mrf.mxu3 }
 0x331   : > { %3704 = vmatpush.msra.mxu2 %v3703_v23  ;;  %3773 = vmatpush.msrb.mxu0 %v3731_v8  ;;  %v3732_v16 = vand.u32 4294901760, %v3731_v8 }
 0x332   : > { %3804 = vmatpush.msrb.mxu1 %v3703_v23 }
 0x333   : > { %3706 = vmatpush.msra.mxu2 %v3705_v14  ;;  %3776 = vmatpush.msrb.mxu0 %v3737_v33  ;;  %v3733_v52 = vsub.f32 %v3731_v8, %v3732_v16 }
 0x334   : > { %3806 = vmatpush.msrb.mxu1 %v3705_v14 }
 0x335   : > { %3708 = vmatpush.msra.mxu2 %v3707_v43  ;;  %3779 = vmatpush.msrb.mxu0 %v3743_v34  ;;  %v3734_v46 = vand.u32 4294901760, %v3733_v52 }
 0x336   : > { %3808 = vmatpush.msrb.mxu1 %v3707_v43  ;;  %3714 = vmatmul.f32.vlgmr.msra.gmra.mxu2 %v5557_v47  ;;  %v3231_v47 = vpop.f32.mrf.mxu2 }
 0x337   : > { %3831 = vmatpush.msrb.mxu2 %v3732_v16  ;;  %3735 = vmatpush.msra.mxu3 %v3734_v46 }
 0x338   : > { %3782 = vmatpush.msrb.mxu0 %v3749_v24  ;;  %3812 = vmatmul.f32.vlgmr.msrb.gmra.mxu1 %v5548_v42  ;;  %v3316_v42 = vpop.f32.mrf.mxu1 }
 0x339   : > { %3835 = vmatpush.msrb.mxu2 %v3738_v38  ;;  %3785 = vmatmul.f32.vlgmr.msrb.gmra.mxu0 %v5543_v18  ;;  %v3160_v18 = vpop.f32.mrf.mxu0 }
 0x33a   : > { %3741 = vmatpush.msra.mxu3 %v3740_v19 }
 0x33b   : > { %3839 = vmatpush.msrb.mxu2 %v3744_v37 }
 0x33c   : > { %3747 = vmatpush.msra.mxu3 %v3746_v1 }
 0x33d   : > { %3843 = vmatpush.msrb.mxu2 %v3750_v60 }
 0x33e   : > { %3753 = vmatpush.msra.mxu3 %v3752_v63  ;;  %3845 = vmatmul.f32.vlgmr.msrb.gmra.mxu2 %v5532_v10 }
 0x33f   : > { %3755 = vmatmul.f32.vlgmr.msra.gmra.mxu3 %v5532_v10 }
 0x340   : > { %3862 = vmatpush.msrb.mxu3 %v3701_v50  ;;  %v3888_v50 = vlaneseq }
 0x341   : > { %v3291_v9 = vpop.f32.mrf.mxu0 }
 0x342   : > { %3864 = vmatpush.msrb.mxu3 %v3703_v23  ;;  %vm3890_vm4 = vcmp.lt.s32.totalorder %v3888_v50, 512 }
 0x344   : > { %3866 = vmatpush.msrb.mxu3 %v3705_v14 }
 0x346   : > { %3868 = vmatpush.msrb.mxu3 %v3707_v43 }
 0x347   : > { %3870 = vmatmul.f32.vlgmr.msrb.gmra.mxu3 %v5532_v10 }
 0x355   : > { %v3443_v55 = vpop.f32.mrf.mxu1 }
 0x356   : > { %v3416_v6 = vpop.f32.mrf.mxu0 }
 0x359   : > { %v3345_v11 = vpop.f32.mrf.mxu2 }
 0x361   : > { %v3476_v17 = vpop.f32.mrf.mxu2 }
 0x362   : > { %v3386_v0 = vpop.f32.mrf.mxu3 }
 0x36a   : > { %v3501_v3 = vpop.f32.mrf.mxu3 }
 0x376   : > { %v3128_v58 = vpop.permute.xlu1 %3127 }
 0x377   : > { %v3130_v61 = vperm.slane %v3128_v58, 0 }
 0x379   : > { %v3346_v7 = vadd.f32 %v3345_v11, %v3130_v61  ;;  %v3161_v10 = vadd.f32 %v3160_v18, %v3130_v61 }
 0x37b   : > { %v3387_v59 = vadd.f32 %v3386_v0, %v3346_v7  ;;  %v3202_v2 = vadd.f32 %v3201_v26, %v3161_v10 }
 0x37d   : > { %v3417_v20 = vadd.f32 %v3416_v6, %v3387_v59  ;;  %v3232_v4 = vadd.f32 %v3231_v47, %v3202_v2 }
 0x37f   : > { %v3444_v29 = vadd.f32 %v3443_v55, %v3417_v20  ;;  %v3259_v28 = vadd.f32 %v3258_v21, %v3232_v4 }
 0x381   : > { %v3477_v39 = vadd.f32 %v3476_v17, %v3444_v29  ;;  %v3292_v48 = vadd.f32 %v3291_v9, %v3259_v28 }
 0x383   : > { %v3502_v14 = vadd.f32 %v3501_v3, %v3477_v39  ;;  %v3317_v34 = vadd.f32 %v3316_v42, %v3292_v48 }
 0x385   : > { %v3878_v8 = vrot.slane %v3502_v14, 7 }
 0x387   : > { %v3882_v37 = vsel %vm3881_vm1, %v3317_v34, %v3878_v8 }
 0x38a   : > { %v3530_v41 = vpop.f32.mrf.mxu0 }
 0x38b   : > { %v3531_v57 = vadd.f32 %v3530_v41, %v3130_v61 }
 0x392   : > { %v3628_v56 = vpop.f32.mrf.mxu3  ;;  %v3661_v25 = vpop.f32.mrf.mxu0 }
 0x393   : > { %v3571_v40 = vpop.f32.mrf.mxu1  ;;  %v3601_v49 = vpop.f32.mrf.mxu2 }
 0x394   : > { %v3572_v13 = vadd.f32 %v3571_v40, %v3531_v57 }
 0x396   : > { %v3602_v5 = vadd.f32 %v3601_v49, %v3572_v13 }
 0x398   : > { %v3629_v27 = vadd.f32 %v3628_v56, %v3602_v5 }
 0x39a   : > { %v3662_v45 = vadd.f32 %v3661_v25, %v3629_v27 }
 0x39b   : > { %v3686_v51 = vpop.f32.mrf.mxu1 }
 0x39c   : > { %v3687_v43 = vadd.f32 %v3686_v51, %v3662_v45 }
 0x39e   : > { %v3879_v38 = vrot.slane %v3687_v43, 6 }
 0x3b5   : > { %v3813_v15 = vpop.f32.mrf.mxu1 }
 0x3b6   : > { %v3786_v30 = vpop.f32.mrf.mxu0 }
 0x3b9   : > { %v3715_v32 = vpop.f32.mrf.mxu2 }
 0x3ba   : > { %v3716_v12 = vadd.f32 %v3715_v32, %v3130_v61 }
 0x3c1   : > { %v3846_v23 = vpop.f32.mrf.mxu2 }
 0x3c2   : > { %v3756_v44 = vpop.f32.mrf.mxu3 }
 0x3c3   : > { %v3757_v53 = vadd.f32 %v3756_v44, %v3716_v12 }
 0x3c5   : > { %v3787_v22 = vadd.f32 %v3786_v30, %v3757_v53 }
 0x3c7   : > { %v3814_v31 = vadd.f32 %v3813_v15, %v3787_v22 }
 0x3c9   : > { %v3847_v36 = vadd.f32 %v3846_v23, %v3814_v31 }
 0x3ca   : > { %v3871_v33 = vpop.f32.mrf.mxu3 }
 0x3cb   : > { %v3872_v24 = vadd.f32 %v3871_v33, %v3847_v36 }
 0x3cd   : > { %v3880_v16 = vrot.slane %v3872_v24, 5 }
 0x3cf   : > { %v3884_v52 = vsel %vm3883_vm2, %v3879_v38, %v3880_v16 }
 0x3d0   : > { %v3886_v62 = vsel %vm3885_vm3, %v3882_v37, %v3884_v52 }
 0x3d1   : > { %3892 = vst.msk [vmem:[%s298_s22] sm:$0xf] %vm3890_vm4, %v3886_v62 }
 0x3d2   : > { %4225 = shalt.err (!%p4222_p4)
}
 0x3d3   : > { %3999 = dma.vmem_to_hbm [thread:$0]  (%p4362_p10), %s3907_s24, 64, %s3909_s6, %s3894_s25  }
 0x3d4 PF: > { %p4010_p5 = scmp.ge.s32.totalorder %s4264_s29, 2  ;;  %s3920_s16 = sand.u32 1, %s4252_s26  }
 0x3d5   : > { %s3921_s19 = scalar_lea.sflag [#allocation5], %s3920_s16 }
 0x3d6   : > { %p4006_p7 = pnand %p4010_p5, %p4366_p11 }
 0x3d8   : > { %p4007_p8 = pneg %p4006_p7 }
 0x3da   : > { %4247 = dma.done.wait (%p4007_p8), %s3921_s19, 64  }
 0x3db   : > { %4249 = vsyncadd (%p4007_p8), %s3921_s19, 4294967232  ;;  %p22_p9 = scmp.ge.s32.totalorder %s4338_s8, 10   ;;  %s5725_s26 = smov %s4256_s27 }
 0x3dc   : > { %s5726_s27 = smov %s4260_s28  ;;  %s5727_s28 = smov %s4350_s11 }
 0x3dd   : > { %s5728_s29 = smov %s4338_s8  ;;  %24 = sbr.rel (!%p22_p9) target bundleno = 8 (0x8), region = 94 }
 0x3e2   :  { %3927 = vsyncpa [#allocation4], 1 }
 0x3e3   :  { %3929 = vsyncpa [#allocation4 + $0x1], 1 }
 0x3e4   :  { %3930 = vsyncpa [#allocation5], 1 }
 0x3e5   :  { %3932 = vsyncpa [#allocation5 + $0x1], 1 }

</bundles_post_ra>
